<compile_context>
chip_gen: v6e
topology: v6e:2x2x1
jax: 0.10.0
libtpu: 0.0.40
codegen_flags: <defaults>
</compile_context>

<pallas_src>
import functools

import numpy as np
import jax
import jax.numpy as jnp
from jax.experimental import pallas as pl
from jax.experimental.pallas import tpu as pltpu

# Scaled-down patch sizes for the synthetic demo (original hard-codes 64 for
# lv1 / 32 for lv2 at 256/128 resolution; we keep the 2:1 ratio).
PATCH_LV1 = 8
PATCH_LV2 = 4


# ----------------------------------------------------------------------------
# Pallas kernel: one big gather matmul + grouped roll/mask fold (9 shifts).
# ----------------------------------------------------------------------------
def _transfer_kernel(idx_ref, refs_ref, mask_ref, iota_ref, out_ref,
                     *, h2, w2, c2, c1, gathered_dtype):
    # idx_ref  : (1, 1, L)    int32  gather indices (R_lv2_star_arg)
    # refs_ref : (1, 9*G, L)  bf16   shift-grouped unfolds, G = c2 + 4*c1
    # mask_ref : (9, L)       f32    batch-invariant edge masks (one per shift)
    # iota_ref : (L, L)       int32  batch-invariant column iota (one-hot build)
    # out_ref  : (1, G, L)    f32    [T_lv2 flat ; 4 lv1 phase planes]
    l = h2 * w2
    grp = c2 + 4 * c1

    # one-hot gather matrix: onehot[j, p] = 1 iff idx[p] == j, so X @ onehot
    # gathers columns of X (== torch.gather along the spatial dim). Exact.
    idx_row = idx_ref[0]                                       # (1, L) int32
    onehot = (iota_ref[...] == idx_row).astype(jnp.bfloat16)   # (L, L)

    # single MXU matmul for all 45 kernel planes of both pyramid levels
    gathered = jnp.dot(refs_ref[0], onehot,
                       preferred_element_type=gathered_dtype)  # (9*G, L)

    masks = mask_ref[...]                                      # (9, L) f32

    # shift-and-accumulate fold: ONE roll + ONE mask multiply per distinct
    # (dy, dx) shift, applied to the whole (G, L) group slab.
    acc = jnp.zeros((grp, l), jnp.float32)
    for s in range(9):
        dy, dx = s // 3 - 1, s % 3 - 1
        slab = gathered[s * grp:(s + 1) * grp, :]
        if dy == 0 and dx == 0:
            acc = acc + slab.astype(jnp.float32)
        else:
            shift = (dy * w2 + dx) % l
            rolled = pltpu.roll(slab, shift, 1)                # XLU lane rotate
            acc = acc + rolled * masks[s:s + 1, :]

    # single lane-dense store: rows [0:c2] are folded T_lv2, rows [c2:] are
    # the 4 lv1 phase planes in (ry, rx) major order.
    out_ref[0] = acc * (1.0 / 9.0)


def _make_shift_masks(h2, w2):
    """Output-coordinate validity masks for the 9 fold shifts (host-built)."""
    l = h2 * w2
    yy, xx = np.divmod(np.arange(l), w2)
    m = np.ones((9, l), np.float32)
    for s in range(9):
        dy, dx = s // 3 - 1, s % 3 - 1
        ok = (yy - dy >= 0) & (yy - dy < h2) & (xx - dx >= 0) & (xx - dx < w2)
        m[s] = ok.astype(np.float32)
    return jnp.asarray(m)


def texture_transfer(idx, ref_stack, c2, c1, h2, w2):
    """Runs the Pallas kernel; grid iterates (in parallel) over batch."""
    n, kkc, l = ref_stack.shape
    grp = c2 + 4 * c1
    assert kkc == 9 * grp

    # bf16 gathered output is exact (one-hot is 0/1) and halves VMEM, but only
    # keep it when the group stride stays bf16 (16,128)-tile aligned; else f32
    # keeps every post-matmul slice (8,128)-aligned (the demo case, G=40).
    gathered_dtype = jnp.bfloat16 if grp % 16 == 0 else jnp.float32

    masks = _make_shift_masks(h2, w2)                       # (9, L) f32
    iota = jax.lax.broadcasted_iota(jnp.int32, (l, l), 0)   # (L, L) int32

    kernel = functools.partial(_transfer_kernel, h2=h2, w2=w2, c2=c2, c1=c1,
                               gathered_dtype=gathered_dtype)

    flops = 2 * n * kkc * l * l
    bytes_accessed = (idx.size * 4 + ref_stack.size * 2 + masks.size * 4
                      + iota.size * 4 + n * grp * l * 4)

    return pl.pallas_call(
        kernel,
        out_shape=jax.ShapeDtypeStruct((n, grp, l), jnp.float32),
        grid_spec=pltpu.PrefetchScalarGridSpec(
            num_scalar_prefetch=0,
            grid=(n,),
            in_specs=[
                pl.BlockSpec((1, 1, l), lambda b: (b, 0, 0)),
                pl.BlockSpec((1, kkc, l), lambda b: (b, 0, 0)),
                # batch-invariant: constant index_map -> fetched once, resident
                pl.BlockSpec((9, l), lambda b: (0, 0)),
                pl.BlockSpec((l, l), lambda b: (0, 0)),
            ],
            out_specs=pl.BlockSpec((1, grp, l), lambda b: (b, 0, 0)),
        ),
        compiler_params=pltpu.CompilerParams(
            dimension_semantics=("parallel",),
            vmem_limit_bytes=48 * 1024 * 1024),
        cost_estimate=pl.CostEstimate(flops=flops, transcendentals=0,
                                      bytes_accessed=bytes_accessed),
    )(idx, ref_stack, masks, iota)


# ----------------------------------------------------------------------------
# Glue: im2col (F.unfold), shift-group row reordering, patch updates.
# ----------------------------------------------------------------------------
def unfold_nchw(x, k, pad, stride):
    """F.unfold, returned with layout (N, k*k, C, L)."""
    n, c, h, w = x.shape
    xp = jnp.pad(x, ((0, 0), (0, 0), (pad, pad), (pad, pad)))
    oh = (h + 2 * pad - k) // stride + 1
    ow = (w + 2 * pad - k) // stride + 1
    cols = []
    for ki in range(k):
        for kj in range(k):
            sl = xp[:, :,
                    ki:ki + stride * (oh - 1) + 1:stride,
                    kj:kj + stride * (ow - 1) + 1:stride]
            cols.append(sl.reshape(n, c, oh * ow))
    return jnp.stack(cols, axis=1)  # (N, k*k, C, oh*ow)


def build_ref_stack(ref_lv2, ref_lv1, h2, w2):
    """Unfold both levels and regroup rows by (dy, dx) fold shift so the
    kernel needs a single roll + mask per shift (layout plumbing only)."""
    n, c2 = ref_lv2.shape[:2]
    c1 = ref_lv1.shape[1]
    l = h2 * w2
    ref2u = unfold_nchw(ref_lv2, 3, 1, 1)        # (N, 9,  C2, L) plane=ki*3+kj
    ref1u = unfold_nchw(ref_lv1, 6, 2, 2)        # (N, 36, C1, L) plane=ki*6+kj
    # lv1 plane (ki,kj): shift (dy,dx)=(ki//2-1, kj//2-1), phase (ry,rx)=(ki%2, kj%2)
    ref1g = (ref1u.reshape(n, 3, 2, 3, 2, c1, l)   # (n, dy, ry, dx, rx, C1, L)
             .transpose(0, 1, 3, 2, 4, 5, 6)       # (n, dy, dx, ry, rx, C1, L)
             .reshape(n, 9, 4 * c1, l))
    groups = jnp.concatenate([ref2u, ref1g], axis=2)   # (n, 9, C2+4*C1, L)
    return groups.reshape(n, 9 * (c2 + 4 * c1), l).astype(jnp.bfloat16)


@functools.lru_cache(maxsize=None)
def make_fold_matrix(k, pad, stride, in_h, in_w, out_h, out_w):
    """Dense F.fold matrix — used ONLY for the host-side reference check."""
    l = in_h * in_w
    m = np.zeros((k * k, l, out_h * out_w), np.float32)
    for ki in range(k):
        for kj in range(k):
            kk = ki * k + kj
            for py in range(in_h):
                for px in range(in_w):
                    y = py * stride + ki - pad
                    x = px * stride + kj - pad
                    if 0 <= y < out_h and 0 <= x < out_w:
                        m[kk, py * in_w + px, y * out_w + x] = 1.0
    return jnp.asarray(m)


def apply_point_updates(ref, hr, points, patch):
    for (p0, p1) in points:
        ref = ref.at[:, :, p0 * patch:(p0 + 1) * patch,
                     p1 * patch:(p1 + 1) * patch].set(
            hr[:, :, p0 * patch:(p0 + 1) * patch,
               p1 * patch:(p1 + 1) * patch])
    return ref


# ----------------------------------------------------------------------------
# Compress70.forward equivalent.
# ----------------------------------------------------------------------------
def compress70_forward(S, H_idx, lr, hr, hr_lv1, hr_lv2, ref_lv1, ref_lv2,
                       Point, idx=0):
    # TODO(synk): file/codec side effects (GMM, J2K, PNG/TIF, bit counting)
    # have no Pallas equivalent; S and lr pass through, bits reported as 0.
    del hr, idx
    n, c2, h2, w2 = hr_lv2.shape
    c1 = hr_lv1.shape[1]
    l = h2 * w2

    # Patch copy of hr features into the reference features (the Point loop).
    ref_lv1 = apply_point_updates(ref_lv1, hr_lv1, Point, PATCH_LV1)
    ref_lv2 = apply_point_updates(ref_lv2, hr_lv2, Point, PATCH_LV2)

    r_lv2_star_arg = H_idx.reshape(n, 1, l).astype(jnp.int32)
    ref_stack = build_ref_stack(ref_lv2, ref_lv1, h2, w2)

    out = texture_transfer(r_lv2_star_arg, ref_stack, c2, c1, h2, w2)

    T_lv2 = out[:, :c2].reshape(n, c2, h2, w2)
    # De-interleave the 4 lv1 phase planes: (n, ry, rx, c, qy, qx)
    #   -> out[n, c, 2*qy+ry, 2*qx+rx]
    T_lv1 = (out[:, c2:].reshape(n, 2, 2, c1, h2, w2)
             .transpose(0, 3, 4, 1, 5, 2)
             .reshape(n, c1, 2 * h2, 2 * w2))
    bits = 0
    return S, r_lv2_star_arg, lr, T_lv2, T_lv1, bits


# ----------------------------------------------------------------------------
# Pure-JAX reference of the unfold -> bis(gather) -> fold hot path
# (bf16-rounded inputs to match the kernel's MXU operand precision).
# ----------------------------------------------------------------------------
def reference_transfer(ref_lv2, ref_lv1, H_idx, h2, w2):
    n, c2 = ref_lv2.shape[:2]
    c1 = ref_lv1.shape[1]
    l = h2 * w2
    r2u = unfold_nchw(ref_lv2, 3, 1, 1).astype(jnp.bfloat16).astype(jnp.float32)
    r1u = unfold_nchw(ref_lv1, 6, 2, 2).astype(jnp.bfloat16).astype(jnp.float32)
    f2 = make_fold_matrix(3, 1, 1, h2, w2, h2, w2)
    f1 = make_fold_matrix(6, 2, 2, h2, w2, 2 * h2, 2 * w2)
    idx_b = H_idx.reshape(n, 1, 1, l)
    g2 = jnp.take_along_axis(r2u, jnp.broadcast_to(idx_b, r2u.shape), axis=-1)
    g1 = jnp.take_along_axis(r1u, jnp.broadcast_to(idx_b, r1u.shape), axis=-1)
    t2 = jnp.einsum("nkcl,klm->ncm", g2, f2) / 9.0
    t1 = jnp.einsum("nkcl,klm->ncm", g1, f1) / 9.0
    return t2.reshape(n, c2, h2, w2), t1.reshape(n, c1, 2 * h2, 2 * w2)


def run_and_check(key, n, c1, c2, h2, w2, point):
    ks = jax.random.split(key, 8)
    h1, w1 = 2 * h2, 2 * w2
    l = h2 * w2
    hr_lv1 = jax.random.normal(ks[0], (n, c1, h1, w1), jnp.float32)
    hr_lv2 = jax.random.normal(ks[1], (n, c2, h2, w2), jnp.float32)
    ref_lv1 = jax.random.normal(ks[2], (n, c1, h1, w1), jnp.float32)
    ref_lv2 = jax.random.normal(ks[3], (n, c2, h2, w2), jnp.float32)
    H_idx = jax.random.randint(ks[4], (n, 1, l), 0, l, dtype=jnp.int32)
    S = jax.random.uniform(ks[5], (n, 1, 4 * h2, 4 * w2), jnp.float32)
    lr = jax.random.normal(ks[6], (n, 3, h2, w2), jnp.float32)
    hr = jax.random.normal(ks[7], (n, 3, 4 * h2, 4 * w2), jnp.float32)

    S_o, R_arg, lr_o, T_lv2, T_lv1, bits = compress70_forward(
        S, H_idx, lr, hr, hr_lv1, hr_lv2, ref_lv1, ref_lv2, point)
    jax.block_until_ready((T_lv2, T_lv1))

    ref1_up = apply_point_updates(ref_lv1, hr_lv1, point, PATCH_LV1)
    ref2_up = apply_point_updates(ref_lv2, hr_lv2, point, PATCH_LV2)
    t2_ref, t1_ref = reference_transfer(ref2_up, ref1_up, H_idx, h2, w2)

    ok2 = jnp.allclose(T_lv2, t2_ref, rtol=2e-2, atol=2e-2)
    ok1 = jnp.allclose(T_lv1, t1_ref, rtol=2e-2, atol=2e-2)
    if not (bool(ok1) and bool(ok2)):
        raise AssertionError(
            "Pallas kernel output mismatch vs JAX reference "
            f"(n={n}, c1={c1}, c2={c2}, h2={h2}, w2={w2})")


# ----------------------------------------------------------------------------
if __name__ == "__main__":
    key = jax.random.PRNGKey(0)
    k_a, k_b = jax.random.split(key)

    # Main demo config: N=2, C1=C2=8, 16x16 lv2 grid (L=256, lane-dense).
    run_and_check(k_a, n=2, c1=8, c2=8, h2=16, w2=16, point=[(0, 0), (1, 1)])

    # Non-square spatial config (h2 != w2, L=128) to lock the roll direction /
    # edge-mask convention beyond the square demo size.
    run_and_check(k_b, n=1, c1=8, c2=8, h2=8, w2=16, point=[(0, 0), (1, 1)])

    print("KERNEL_OK")
</pallas_src>

<mosaic_0001>
module attributes {stable_mosaic.version = 11 : i64} {
  func.func @_transfer_kernel(%arg0: i32, %arg1: memref<1x1x256xi32, #tpu.memory_space<vmem>>, %arg2: memref<1x360x256xbf16, #tpu.memory_space<vmem>>, %arg3: memref<9x256xf32, #tpu.memory_space<vmem>>, %arg4: memref<256x256xi32, #tpu.memory_space<vmem>>, %arg5: memref<1x40x256xf32, #tpu.memory_space<vmem>>) attributes {dimension_semantics = [#tpu.dimension_semantics<parallel>], iteration_bounds = array<i64: 2>, scalar_prefetch = 0 : i64, scratch_operands = 0 : i64, tpu.core_type = #tpu.core_type<tc>, window_params = [{transform_indices = @transform_0, window_bounds = array<i64: 1, 1, 256>}, {transform_indices = @transform_1, window_bounds = array<i64: 1, 360, 256>}, {pipeline_mode = #tpu.pipeline_mode<synchronous>, transform_indices = @transform_2, window_bounds = array<i64: 9, 256>}, {pipeline_mode = #tpu.pipeline_mode<synchronous>, transform_indices = @transform_3, window_bounds = array<i64: 256, 256>}, {transform_indices = @transform_4, window_bounds = array<i64: 1, 40, 256>}]} {
    %c0 = arith.constant 0 : index
    %c0_0 = arith.constant 0 : index
    %c0_1 = arith.constant 0 : index
    %0 = vector.load %arg1[%c0, %c0_0, %c0_1] : memref<1x1x256xi32, #tpu.memory_space<vmem>>, vector<1x1x256xi32>
    %1 = vector.shape_cast %0 : vector<1x1x256xi32> to vector<1x256xi32>
    %c0_2 = arith.constant 0 : index
    %c0_3 = arith.constant 0 : index
    %2 = vector.load %arg4[%c0_2, %c0_3] : memref<256x256xi32, #tpu.memory_space<vmem>>, vector<256x256xi32>
    %3 = vector.broadcast %1 : vector<1x256xi32> to vector<256x256xi32>
    %4 = arith.cmpi eq, %2, %3 : vector<256x256xi32>
    %5 = arith.extui %4 : vector<256x256xi1> to vector<256x256xi32>
    %6 = arith.sitofp %5 : vector<256x256xi32> to vector<256x256xf32>
    %7 = arith.truncf %6 : vector<256x256xf32> to vector<256x256xbf16>
    %c0_4 = arith.constant 0 : index
    %c0_5 = arith.constant 0 : index
    %c0_6 = arith.constant 0 : index
    %8 = vector.load %arg2[%c0_4, %c0_5, %c0_6] : memref<1x360x256xbf16, #tpu.memory_space<vmem>>, vector<1x360x256xbf16>
    %9 = vector.shape_cast %8 : vector<1x360x256xbf16> to vector<360x256xbf16>
    %cst = arith.constant dense<0.000000e+00> : vector<360x256xf32>
    %10 = tpu.matmul %9, %7, %cst {dimension_numbers = #tpu.dot_dimension_numbers<[1], [0], [0], [1], [0, 0, 1, 1], [], []>} : vector<360x256xbf16>, vector<256x256xbf16>, vector<360x256xf32> -> vector<360x256xf32>
    %c0_7 = arith.constant 0 : index
    %c0_8 = arith.constant 0 : index
    %11 = vector.load %arg3[%c0_7, %c0_8] : memref<9x256xf32, #tpu.memory_space<vmem>>, vector<9x256xf32>
    %cst_9 = arith.constant 0.000000e+00 : f32
    %12 = vector.broadcast %cst_9 : f32 to vector<40x256xf32>
    %13 = vector.extract_strided_slice %10 {offsets = [0, 0], sizes = [40, 256], strides = [1, 1]} : vector<360x256xf32> to vector<40x256xf32>
    %c239_i32 = arith.constant 239 : i32
    %14 = tpu.dynamic_rotate %13 by %c239_i32 dim 1 : vector<40x256xf32>, i32 -> vector<40x256xf32>
    %15 = vector.extract_strided_slice %11 {offsets = [0, 0], sizes = [1, 256], strides = [1, 1]} : vector<9x256xf32> to vector<1x256xf32>
    %16 = vector.broadcast %15 : vector<1x256xf32> to vector<40x256xf32>
    %17 = arith.mulf %14, %16 : vector<40x256xf32>
    %18 = arith.addf %12, %17 : vector<40x256xf32>
    %19 = vector.extract_strided_slice %10 {offsets = [40, 0], sizes = [40, 256], strides = [1, 1]} : vector<360x256xf32> to vector<40x256xf32>
    %c240_i32 = arith.constant 240 : i32
    %20 = tpu.dynamic_rotate %19 by %c240_i32 dim 1 : vector<40x256xf32>, i32 -> vector<40x256xf32>
    %21 = vector.extract_strided_slice %11 {offsets = [1, 0], sizes = [1, 256], strides = [1, 1]} : vector<9x256xf32> to vector<1x256xf32>
    %22 = vector.broadcast %21 : vector<1x256xf32> to vector<40x256xf32>
    %23 = arith.mulf %20, %22 : vector<40x256xf32>
    %24 = arith.addf %18, %23 : vector<40x256xf32>
    %25 = vector.extract_strided_slice %10 {offsets = [80, 0], sizes = [40, 256], strides = [1, 1]} : vector<360x256xf32> to vector<40x256xf32>
    %c241_i32 = arith.constant 241 : i32
    %26 = tpu.dynamic_rotate %25 by %c241_i32 dim 1 : vector<40x256xf32>, i32 -> vector<40x256xf32>
    %27 = vector.extract_strided_slice %11 {offsets = [2, 0], sizes = [1, 256], strides = [1, 1]} : vector<9x256xf32> to vector<1x256xf32>
    %28 = vector.broadcast %27 : vector<1x256xf32> to vector<40x256xf32>
    %29 = arith.mulf %26, %28 : vector<40x256xf32>
    %30 = arith.addf %24, %29 : vector<40x256xf32>
    %31 = vector.extract_strided_slice %10 {offsets = [120, 0], sizes = [40, 256], strides = [1, 1]} : vector<360x256xf32> to vector<40x256xf32>
    %c255_i32 = arith.constant 255 : i32
    %32 = tpu.dynamic_rotate %31 by %c255_i32 dim 1 : vector<40x256xf32>, i32 -> vector<40x256xf32>
    %33 = vector.extract_strided_slice %11 {offsets = [3, 0], sizes = [1, 256], strides = [1, 1]} : vector<9x256xf32> to vector<1x256xf32>
    %34 = vector.broadcast %33 : vector<1x256xf32> to vector<40x256xf32>
    %35 = arith.mulf %32, %34 : vector<40x256xf32>
    %36 = arith.addf %30, %35 : vector<40x256xf32>
    %37 = vector.extract_strided_slice %10 {offsets = [160, 0], sizes = [40, 256], strides = [1, 1]} : vector<360x256xf32> to vector<40x256xf32>
    %38 = arith.addf %36, %37 : vector<40x256xf32>
    %39 = vector.extract_strided_slice %10 {offsets = [200, 0], sizes = [40, 256], strides = [1, 1]} : vector<360x256xf32> to vector<40x256xf32>
    %c1_i32 = arith.constant 1 : i32
    %40 = tpu.dynamic_rotate %39 by %c1_i32 dim 1 : vector<40x256xf32>, i32 -> vector<40x256xf32>
    %41 = vector.extract_strided_slice %11 {offsets = [5, 0], sizes = [1, 256], strides = [1, 1]} : vector<9x256xf32> to vector<1x256xf32>
    %42 = vector.broadcast %41 : vector<1x256xf32> to vector<40x256xf32>
    %43 = arith.mulf %40, %42 : vector<40x256xf32>
    %44 = arith.addf %38, %43 : vector<40x256xf32>
    %45 = vector.extract_strided_slice %10 {offsets = [240, 0], sizes = [40, 256], strides = [1, 1]} : vector<360x256xf32> to vector<40x256xf32>
    %c15_i32 = arith.constant 15 : i32
    %46 = tpu.dynamic_rotate %45 by %c15_i32 dim 1 : vector<40x256xf32>, i32 -> vector<40x256xf32>
    %47 = vector.extract_strided_slice %11 {offsets = [6, 0], sizes = [1, 256], strides = [1, 1]} : vector<9x256xf32> to vector<1x256xf32>
    %48 = vector.broadcast %47 : vector<1x256xf32> to vector<40x256xf32>
    %49 = arith.mulf %46, %48 : vector<40x256xf32>
    %50 = arith.addf %44, %49 : vector<40x256xf32>
    %51 = vector.extract_strided_slice %10 {offsets = [280, 0], sizes = [40, 256], strides = [1, 1]} : vector<360x256xf32> to vector<40x256xf32>
    %c16_i32 = arith.constant 16 : i32
    %52 = tpu.dynamic_rotate %51 by %c16_i32 dim 1 : vector<40x256xf32>, i32 -> vector<40x256xf32>
    %53 = vector.extract_strided_slice %11 {offsets = [7, 0], sizes = [1, 256], strides = [1, 1]} : vector<9x256xf32> to vector<1x256xf32>
    %54 = vector.broadcast %53 : vector<1x256xf32> to vector<40x256xf32>
    %55 = arith.mulf %52, %54 : vector<40x256xf32>
    %56 = arith.addf %50, %55 : vector<40x256xf32>
    %57 = vector.extract_strided_slice %10 {offsets = [320, 0], sizes = [40, 256], strides = [1, 1]} : vector<360x256xf32> to vector<40x256xf32>
    %c17_i32 = arith.constant 17 : i32
    %58 = tpu.dynamic_rotate %57 by %c17_i32 dim 1 : vector<40x256xf32>, i32 -> vector<40x256xf32>
    %59 = vector.extract_strided_slice %11 {offsets = [8, 0], sizes = [1, 256], strides = [1, 1]} : vector<9x256xf32> to vector<1x256xf32>
    %60 = vector.broadcast %59 : vector<1x256xf32> to vector<40x256xf32>
    %61 = arith.mulf %58, %60 : vector<40x256xf32>
    %62 = arith.addf %56, %61 : vector<40x256xf32>
    %cst_10 = arith.constant 0.111111112 : f32
    %63 = vector.broadcast %cst_10 : f32 to vector<40x256xf32>
    %64 = arith.mulf %62, %63 : vector<40x256xf32>
    %c0_11 = arith.constant 0 : index
    %c0_12 = arith.constant 0 : index
    %c0_13 = arith.constant 0 : index
    %65 = vector.load %arg5[%c0_11, %c0_12, %c0_13] : memref<1x40x256xf32, #tpu.memory_space<vmem>>, vector<1x40x256xf32>
    %66 = vector.shape_cast %65 : vector<1x40x256xf32> to vector<40x256xf32>
    %67 = vector.shape_cast %64 : vector<40x256xf32> to vector<1x40x256xf32>
    tpu.vector_store %arg5[%c0_11, %c0_12, %c0_13], %67 {strides = array<i32>} : memref<1x40x256xf32, #tpu.memory_space<vmem>>, vector<1x40x256xf32>,
    return
  }
  func.func @transform_0(%arg0: i32) -> (i32, i32, i32) {
    %c0_i32 = arith.constant 0 : i32
    %c0_i32_0 = arith.constant 0 : i32
    %c0_i32_1 = arith.constant 0 : i32
    return %arg0, %c0_i32, %c0_i32_0 : i32, i32, i32
  }
  func.func @transform_1(%arg0: i32) -> (i32, i32, i32) {
    %c0_i32 = arith.constant 0 : i32
    %c0_i32_0 = arith.constant 0 : i32
    %c0_i32_1 = arith.constant 0 : i32
    return %arg0, %c0_i32, %c0_i32_0 : i32, i32, i32
  }
  func.func @transform_2(%arg0: i32) -> (i32, i32) {
    %c0_i32 = arith.constant 0 : i32
    %c0_i32_0 = arith.constant 0 : i32
    %c0_i32_1 = arith.constant 0 : i32
    return %c0_i32, %c0_i32_0 : i32, i32
  }
  func.func @transform_3(%arg0: i32) -> (i32, i32) {
    %c0_i32 = arith.constant 0 : i32
    %c0_i32_0 = arith.constant 0 : i32
    %c0_i32_1 = arith.constant 0 : i32
    return %c0_i32, %c0_i32_0 : i32, i32
  }
  func.func @transform_4(%arg0: i32) -> (i32, i32, i32) {
    %c0_i32 = arith.constant 0 : i32
    %c0_i32_0 = arith.constant 0 : i32
    %c0_i32_1 = arith.constant 0 : i32
    return %arg0, %c0_i32, %c0_i32_0 : i32, i32, i32
  }
}

</mosaic_0001>

<bundles_post_ra>
// kernel: tpu_custom_call.1
= control target key start
LH: loop header
LB: loop body
LE: loop exit
PB: predicated region body
PF: predicated region fallthrough
CT: control target
= control target key end

     0   :  { %9 = vsyncpa [#allocation3], 0  ;;  %s3463_s0 = inlined_call_operand.hbm [shape: s32[2,1,256], index: 0, kind: input, shape index: {}]   ;;  %s3464_s1 = inlined_call_operand.hbm [shape: bf16[2,360,256], index: 1, kind: input, shape index: {}]   ;;  %s3465_s2 = inlined_call_operand.hbm [shape: f32[9,256], index: 2, kind: input, shape index: {}]   ;;  %s3466_s3 = inlined_call_operand.hbm [shape: s32[256,256], index: 3, kind: input, shape index: {}]   ;;  %s3467_s4 = inlined_call_operand.hbm [shape: f32[2,40,256], index: 4, kind: output, shape index: {}]  }
   0x1   :  { %11 = vsyncpa [#allocation3 + $0x1], 0 }
   0x2   :  { %12 = vsyncpa [#allocation6], 0 }
   0x3   :  { %14 = vsyncpa [#allocation6 + $0x1], 0 }
   0x4   :  { %15 = vsyncpa [#allocation9], 0 }
   0x5   :  { %16 = vsyncpa [#allocation4], 0 }
   0x6   :  { %18 = vsyncpa [#allocation4 + $0x1], 0  ;;  %s2364_s15 = smov 0   ;;  %s2366_s16 = smov 0  }
   0x7   :  { %s2368_s17 = smov 0   ;;  %s2370_s18 = smov 0  }
   0x8 LB: > { %s2385_s19 = sadd.s32 4294967295, %s2318_s18   ;;  %s1750_s20 = sadd.s32 4294967294, %s2318_s18   ;;  %s2318_s18 = sphi %s2370_s18, %s3519_s18   ;;  %s2314_s17 = sphi %s2368_s17, %s3518_s17   ;;  %s2310_s16 = sphi %s2366_s16, %s3517_s16   ;;  %s2306_s15 = sphi %s2364_s15, %s3516_s15  }
   0x9   : > { %p44_p0 = scmp.ne.s32.totalorder %s2310_s16, %s2306_s15  ;;  %p3468_p1 = scmp.eq.s32.totalorder %s2385_s19, 0 }
   0xa   : > { %p142_p3 = scmp.eq.s32.totalorder %s1750_s20, 1  ;;  %p1751_p5 = scmp.ge.s32.totalorder %s2318_s18, 1 }
   0xb   : > { %p2394_p4 = por %p3468_p1, %p44_p0  ;;  %p149_p7 = scmp.lt.s32.totalorder %s2318_s18, 3 }
   0xc   : > { %p2399_p6 = por %p142_p3, %p44_p0  ;;  %s2320_s24 = smov [#allocation7]  }
   0xd   : > { %s3477_s21 = scalar_select %p2394_p4, 1, 0 }
   0xe   : > { %s3478_s22 = scalar_select %p2399_p6, 1, 0 }
   0xf   : > { %p2404_p8 = pnand %p1751_p5, %p149_p7  ;;  %s161_s25 = sshll.u32 %s2320_s24, 4  ;;  %s162_s25 = int_to_ptr.vmem [resolvable:$true] %s161_s25 }
  0x10   : > { %s2321_s27 = smov [#allocation8]   ;;  %s2145_s29 = scalar_lea.vmem %s162_s25, 512 }
  0x11   : > { %p1994_p9 = pneg %p2404_p8  ;;  %s174_s28 = sshll.u32 %s2321_s27, 4  ;;  %s175_s28 = int_to_ptr.vmem [resolvable:$true] %s174_s28 }
  0x12   : > { %p2146_p13 = scmp.ne.s32.totalorder %s162_s25, %s2145_s29  ;;  %p2153_p5 = scmp.lt.s32.totalorder %s162_s25, %s162_s25 }
  0x13   : > { %p2413_p11 = pnand %p1994_p9, %p3468_p1  ;;  %p2154_p7 = scmp.lt.s32.totalorder %s2145_s29, %s2145_s29 }
  0x15   : > { %p2136_p12 = pneg %p2413_p11  ;;  %p2155_p10 = por %p2154_p7, %p2153_p5 }
  0x17   : > { %p2148_p0 = pnand %p2146_p13, %p2136_p12 }
  0x19   : > { %p2149_p3 = pneg %p2148_p0 }
  0x1b   : > { %p2156_p9 = pnand %p2155_p10, %p2149_p3 }
  0x1d   : > { %2159 = shalt.err (!%p2156_p9)
}
  0x1e   : > { %s2322_s30 = smov 256   ;;  %s2323_s5 = smov 16  }
  0x1f   : > { %1997 = dma.hbm_to_vmem [thread:$0]  (!%p2413_p11), %s3465_s2, 512, %s162_s25, [#allocation6], %s2322_s30, %s2322_s30, %s2323_s5  }
  0x20   : > { %s2171_s8 = scalar_lea.vmem %s175_s28, 8192  ;;  %p2179_p2 = scmp.lt.s32.totalorder %s175_s28, %s175_s28 }
  0x21   : > { %p2172_p1 = scmp.ne.s32.totalorder %s175_s28, %s2171_s8  ;;  %p2180_p6 = scmp.lt.s32.totalorder %s2171_s8, %s2171_s8 }
  0x23   : > { %p2174_p13 = pnand %p2172_p1, %p2136_p12  ;;  %p2181_p5 = por %p2180_p6, %p2179_p2 }
  0x25   : > { %p2175_p0 = pneg %p2174_p13 }
  0x27   : > { %p2182_p10 = pnand %p2181_p5, %p2175_p0 }
  0x29   : > { %2185 = shalt.err (!%p2182_p10)
}
  0x2a   : > { %2000 = dma.hbm_to_vmem [thread:$0]  (!%p2413_p11), %s3466_s3, 8192, %s175_s28, [#allocation9], %s2322_s30, %s2322_s30, %s2323_s5  }
  0x2b   : > { %s2436_s11 = sadd.s32 1, %s2318_s18   ;;  %s31_s12 = sadd.s32 1, %s2314_s17 }
  0x2c   : > { %s28_s13 = ssub.s32 %s2318_s18, %s2436_s11  ;;  %p38_p1 = scmp.ne.s32.totalorder %s2314_s17, %s2310_s16 }
  0x2d   : > { %p29_p2 = scmp.eq.s32.totalorder %s28_s13, 0  ;;  %p39_p6 = scmp.eq.s32.totalorder %s2318_s18, 0 }
  0x2e   : > { %p3481_p12 = scmp.eq.s32.totalorder %s2385_s19, 1  ;;  %p2014_p7 = scmp.lt.s32.totalorder %s2318_s18, 2 }
  0x2f   : > { %s2452_s20 = scalar_select %p29_p2, %s2314_s17, %s31_s12  }
  0x30   : > { %p2446_p3 = por %p3481_p12, %p38_p1  ;;  %p40_p9 = por %p39_p6, %p38_p1 }
  0x31   : > { %s2455_s24 = sand.u32 1, %s2314_s17   ;;  %s1942_s26 = sshll.u32 %s2318_s18, 5 }
  0x32   : > { %s3482_s14 = scalar_select %p2446_p3, 1, 0 }
  0x33   : > { %s1755_s25 = sshll.u32 %s2455_s24, 1  ;;  %s2462_s29 = scalar_lea.hbm %s3463_s0, %s1942_s26 }
  0x34   : > { %s192_s30 = scalar_lea.vmem [#allocation2], %s1755_s25  ;;  %p2466_p11 = pnand %p2014_p7, %p40_p9 }
  0x35   : > { %s200_s5 = sshll.u32 %s192_s30, 4  ;;  %s1975_s7 = smul.u32 360, %s2455_s24  ;;  %s2464_s5 = int_to_ptr.vmem [resolvable:$true] %s200_s5 }
  0x36   : > { %s207_s8 = sand.u32 1, %s2318_s18   ;;  %s189_s9 = scalar_lea.sflag [#allocation3], %s2455_s24 }
  0x37   : > { %s2186_s10 = scalar_lea.hbm %s2462_s29, 32  ;;  %p2188_p0 = pneg %p2466_p11 }
  0x38   : > { %p2187_p13 = scmp.ne.s32.totalorder %s2462_s29, %s2186_s10  ;;  %s2191_s25 = scalar_lea.hbm %s3463_s0, 64 }
  0x39   : > { %p2192_p1 = scmp.lt.s32.totalorder %s2462_s29, %s3463_s0  ;;  %p2193_p2 = scmp.lt.s32.totalorder %s2191_s25, %s2186_s10 }
  0x3a   : > { %p2189_p5 = pnand %p2188_p0, %p2187_p13 }
  0x3b   : > { %p2194_p6 = por %p2193_p2, %p2192_p1 }
  0x3c   : > { %p2190_p10 = pneg %p2189_p5 }
  0x3e   : > { %p2195_p12 = pnand %p2194_p6, %p2190_p10 }
  0x40   : > { %2198 = shalt.err (!%p2195_p12)
}
  0x41   : > { %s2199_s28 = scalar_lea.vmem %s2464_s5, 32  ;;  %s2324_s30 = smov [#allocation2]  }
  0x42   : > { %p2200_p7 = scmp.ne.s32.totalorder %s2464_s5, %s2199_s28  ;;  %s2204_s12 = sshll.u32 %s2324_s30, 4  ;;  %s2205_s12 = int_to_ptr.vmem [resolvable:$false] %s2204_s12 }
  0x43   : > { %s2206_s13 = scalar_lea.vmem %s2205_s12, 64  ;;  %p2207_p5 = scmp.lt.s32.totalorder %s2464_s5, %s2205_s12 }
  0x44   : > { %p2202_p9 = pnand %p2200_p7, %p2188_p0  ;;  %p2208_p3 = scmp.lt.s32.totalorder %s2206_s13, %s2199_s28 }
  0x46   : > { %p2203_p13 = pneg %p2202_p9  ;;  %p2209_p4 = por %p2208_p3, %p2207_p5 }
  0x48   : > { %p2210_p1 = pnand %p2209_p4, %p2203_p13 }
  0x4a   : > { %2213 = shalt.err (!%p2210_p1)
}
  0x4b   : > { %2004 = dma.hbm_to_vmem [thread:$0]  (!%p2466_p11), %s2462_s29, 32, %s2464_s5, %s189_s9  }
  0x4c   : > { %s1976_s10 = smul.u32 5760, %s2318_s18  ;;  %s211_s25 = scalar_lea.vmem [#allocation5], %s1975_s7 }
  0x4d   : > { %s218_s26 = sshll.u32 %s211_s25, 4  ;;  %s2509_s12 = scalar_lea.sflag [#allocation6], %s207_s8  ;;  %s2500_s26 = int_to_ptr.vmem [resolvable:$true] %s218_s26 }
  0x4e   : > { %s2505_s30 = scalar_lea.hbm %s3464_s1, %s1976_s10  ;;  %s2219_s5 = scalar_lea.hbm %s3464_s1, 11520 }
  0x4f   : > { %s2214_s13 = scalar_lea.hbm %s2505_s30, 5760  ;;  %p2220_p2 = scmp.lt.s32.totalorder %s2505_s30, %s3464_s1 }
  0x50   : > { %p2215_p4 = scmp.ne.s32.totalorder %s2505_s30, %s2214_s13  ;;  %p2221_p6 = scmp.lt.s32.totalorder %s2219_s5, %s2214_s13 }
  0x52   : > { %p2217_p3 = pnand %p2215_p4, %p2188_p0  ;;  %p2222_p12 = por %p2221_p6, %p2220_p2 }
  0x54   : > { %p2218_p10 = pneg %p2217_p3 }
  0x56   : > { %p2223_p7 = pnand %p2222_p12, %p2218_p10 }
  0x58   : > { %2226 = shalt.err (!%p2223_p7)
}
  0x59   : > { %s2227_s8 = scalar_lea.vmem %s2500_s26, 5760  ;;  %s2325_s10 = smov [#allocation5]  }
  0x5a   : > { %p2228_p9 = scmp.ne.s32.totalorder %s2500_s26, %s2227_s8  ;;  %s2232_s25 = sshll.u32 %s2325_s10, 4  ;;  %s2233_s25 = int_to_ptr.vmem [resolvable:$false] %s2232_s25 }
  0x5b   : > { %s2234_s27 = scalar_lea.vmem %s2233_s25, 11520  ;;  %p2235_p1 = scmp.lt.s32.totalorder %s2500_s26, %s2233_s25 }
  0x5c   : > { %p2230_p13 = pnand %p2228_p9, %p2188_p0  ;;  %p2236_p4 = scmp.lt.s32.totalorder %s2234_s27, %s2227_s8 }
  0x5e   : > { %p2231_p5 = pneg %p2230_p13  ;;  %p2237_p3 = por %p2236_p4, %p2235_p1 }
  0x60   : > { %p2238_p2 = pnand %p2237_p3, %p2231_p5 }
  0x62   : > { %2241 = shalt.err (!%p2238_p2)
}
  0x63   : > { %s2326_s28 = smov 128   ;;  %s2327_s13 = smov 8  }
  0x64   : > { %2007 = dma.hbm_to_vmem [thread:$0]  (!%p2466_p11), %s2505_s30, 5760, %s2500_s26, %s2509_s12, %s2326_s28, %s2326_s28, %s2327_s13  }
  0x65   : > { %230 = sbr.rel (%p2404_p8) target bundleno = 683 (0x2ab), region = 36 }
  0x6a   : > { %s2537_s24 = sand.u32 1, %s2310_s16   ;;  %p3484_p0 = scmp.ne.s32.totalorder %s3477_s21, 0 }
  0x6b   : > { %s1760_s29 = sshll.u32 %s2537_s24, 1  ;;  %s233_s5 = scalar_lea.sflag [#allocation3], %s2537_s24 }
  0x6c   : > { %s236_s7 = scalar_lea.vmem [#allocation2], %s1760_s29 }
  0x6d   : > { %2285 = dma.done.wait (%p3484_p0), %s233_s5, 32  }
  0x6e   : > { %2287 = vsyncadd (%p3484_p0), %s233_s5, 4294967264  ;;  %s241_s6 = sand.u32 1, %s2385_s19   ;;  %s1977_s23 = smul.u32 360, %s2537_s24 }
  0x6f   : > { %s242_s26 = scalar_lea.sflag [#allocation6], %s241_s6 }
  0x70   : > { %s2547_s30 = scalar_lea.vmem [#allocation5], %s1977_s23 }
  0x71   : > { %2289 = dma.done.wait (%p3484_p0), %s242_s26, 5760  }
  0x72   : > { %2291 = vsyncadd (%p3484_p0), %s242_s26, 4294961536  ;;  %p3485_p8 = scmp.eq.s32.totalorder %s2385_s19, 0 }
  0x74   : > { %2293 = dma.done.wait (%p3485_p8), [#allocation6], 512   ;;  %p3486_p11 = pmov %p3485_p8 }
  0x75   : > { %p3487_p10 = pmov %p3485_p8 }
  0x76   : > { %2295 = vsyncadd (%p3486_p11), [#allocation6], 4294966784 }
  0x77   : > { %2297 = dma.done.wait (%p3487_p10), [#allocation9], 8192   ;;  %p3488_p6 = pmov %p3485_p8 }
  0x78   : > { %v348_v0 = vlaneseq  ;;  %v283_v4 = vld [vmem:[%s236_s7] sm:$0x3]  ;;  %v315_v6 = vld [vmem:[#allocation8 + $0xf8] sm:$0xff]  ;;  %v312_v8 = vld [vmem:[#allocation8 + $0xe0] sm:$0xff]  ;;  %v2328_v17 = vmov 1.0|1.0  }
  0x79   : > { %2299 = vsyncadd (%p3488_p6), [#allocation9], 4294959104  ;;  %v313_v5 = vld [vmem:[#allocation8 + $0xe8] sm:$0xff]  ;;  %v314_v9 = vld [vmem:[#allocation8 + $0xf0] sm:$0xff]  ;;  %s2329_s21 = smov 111   ;;  %s2330_s12 = smov 1  }
  0x7a   : > { %v2562_v1 = vshrl.u32 %v348_v0, 7  ;;  %v309_v11 = vld [vmem:[#allocation8 + $0xc8] sm:$0xff]  ;;  %v311_v12 = vld [vmem:[#allocation8 + $0xd8] sm:$0xff]  ;;  %v308_v13 = vld [vmem:[#allocation8 + $0xc0] sm:$0xff]  ;;  %s2331_s9 = smov 112   ;;  %s2332_s8 = smov 15  }
  0x7b   : > { %v310_v14 = vld [vmem:[#allocation8 + $0xd0] sm:$0xff]  ;;  %v305_v15 = vld [vmem:[#allocation8 + $0xa8] sm:$0xff]  ;;  %v307_v16 = vld [vmem:[#allocation8 + $0xb8] sm:$0xff]  ;;  %s2333_s10 = smov 113   ;;  %s2334_s25 = smov 16  }
  0x7c   : > { %v2565_v2 = vsub.s32 1, %v2562_v1  ;;  %v2568_v3 = vsub.s32 0, %v2562_v1  ;;  %v304_v18 = vld [vmem:[#allocation8 + $0xa0] sm:$0xff]  ;;  %v306_v19 = vld [vmem:[#allocation8 + $0xb0] sm:$0xff]  ;;  %v301_v20 = vld [vmem:[#allocation8 + $0x88] sm:$0xff]  ;;  %s2335_s27 = smov 127  }
  0x7d   : > { %v303_v21 = vld [vmem:[#allocation8 + $0x98] sm:$0xff]  ;;  %v300_v22 = vld [vmem:[#allocation8 + $0x80] sm:$0xff]  ;;  %v302_v23 = vld [vmem:[#allocation8 + $0x90] sm:$0xff]  ;;  %s2336_s28 = smov 17   ;;  %s1978_s13 = smul.u32 80, %s2537_s24 }
  0x7e   : > { %v2571_v7 = vrot.slane %v283_v4, %v2565_v2  ;;  %v2574_v10 = vrot.slane %v283_v4, %v2568_v3  ;;  %v297_v24 = vld [vmem:[#allocation8 + $0x68] sm:$0xff]  ;;  %v299_v25 = vld [vmem:[#allocation8 + $0x78] sm:$0xff]  ;;  %v296_v26 = vld [vmem:[#allocation8 + $0x60] sm:$0xff]  ;;  %s1979_s5 = smul.u32 1280, %s2385_s19  ;;  %s1622_s26 = scalar_lea.sflag [#allocation4], %s2537_s24 }
  0x7f   : > { %v298_v27 = vld [vmem:[#allocation8 + $0x70] sm:$0xff]  ;;  %v293_v28 = vld [vmem:[#allocation8 + $0x48] sm:$0xff]  ;;  %v295_v29 = vld [vmem:[#allocation8 + $0x58] sm:$0xff]  ;;  %s3382_s29 = scalar_lea.vmem [#allocation10], %s1978_s13  ;;  %p3513_p7 = scmp.ne.s32.totalorder %s3482_s14, 0 }
  0x80   : > { %vm385_vm0 = vcmp.eq.s32.totalorder %v313_v5, %v2571_v7  ;;  %vm387_vm1 = vcmp.eq.s32.totalorder %v315_v6, %v2571_v7  ;;  %vm384_vm2 = vcmp.eq.s32.totalorder %v312_v8, %v2574_v10  ;;  %vm386_vm3 = vcmp.eq.s32.totalorder %v314_v9, %v2574_v10  ;;  %v292_v30 = vld [vmem:[#allocation8 + $0x40] sm:$0xff]  ;;  %v294_v31 = vld [vmem:[#allocation8 + $0x50] sm:$0xff]  ;;  %v289_v32 = vld [vmem:[#allocation8 + $0x28] sm:$0xff]  ;;  %s1635_s7 = sshll.u32 %s3382_s29, 4  ;;  %s3415_s23 = scalar_lea.hbm %s3467_s4, %s1979_s5  ;;  %s3417_s7 = int_to_ptr.vmem [resolvable:$true] %s1635_s7 }
  0x81   : > { %vm1873_vm4 = vmpackc.low %vm387_vm1, %vm385_vm0  ;;  %vm381_vm5 = vcmp.eq.s32.totalorder %v309_v11, %v2571_v7  ;;  %vm383_vm6 = vcmp.eq.s32.totalorder %v311_v12, %v2571_v7  ;;  %vm380_vm7 = vcmp.eq.s32.totalorder %v308_v13, %v2574_v10  ;;  %vm382_vm8 = vcmp.eq.s32.totalorder %v310_v14, %v2574_v10  ;;  %v291_v33 = vld [vmem:[#allocation8 + $0x38] sm:$0xff]  ;;  %v288_v34 = vld [vmem:[#allocation8 + $0x20] sm:$0xff] }
  0x82   : > { %1874 = vmatprep.subr.msk.bf16.mxu0 %vm1873_vm4, %v2328_v17  ;;  %1943 = vmatprep.subr.msk.bf16.mxu1 %vm1873_vm4, %v2328_v17  ;;  %vm1875_vm9 = vmpackc.low %vm386_vm3, %vm384_vm2  ;;  %vm377_vm10 = vcmp.eq.s32.totalorder %v305_v15, %v2571_v7  ;;  %vm379_vm11 = vcmp.eq.s32.totalorder %v307_v16, %v2571_v7  ;;  %vm376_vm15 = vcmp.eq.s32.totalorder %v304_v18, %v2574_v10  ;;  %v290_v35 = vld [vmem:[#allocation8 + $0x30] sm:$0xff]  ;;  %v285_v36 = vld [vmem:[#allocation8 + $0x8] sm:$0xff] }
  0x83   : > { %1876 = vmatpush1.bf16.msk.msra.mxu0 %vm1875_vm9, %v2328_v17  ;;  %1959 = vmatpush1.bf16.msk.msra.mxu1 %vm1875_vm9, %v2328_v17  ;;  %vm1877_vm12 = vmpackc.low %vm383_vm6, %vm381_vm5  ;;  %vm378_vm0 = vcmp.eq.s32.totalorder %v306_v19, %v2574_v10  ;;  %vm373_vm1 = vcmp.eq.s32.totalorder %v301_v20, %v2571_v7  ;;  %vm375_vm2 = vcmp.eq.s32.totalorder %v303_v21, %v2571_v7  ;;  %v287_v37 = vld [vmem:[#allocation8 + $0x18] sm:$0xff]  ;;  %v284_v38 = vld [vmem:[#allocation8] sm:$0xff] }
  0x84   : > { %1878 = vmatprep.subr.msk.bf16.mxu0 %vm1877_vm12, %v2328_v17  ;;  %1944 = vmatprep.subr.msk.bf16.mxu1 %vm1877_vm12, %v2328_v17  ;;  %vm1879_vm13 = vmpackc.low %vm382_vm8, %vm380_vm7  ;;  %vm372_vm5 = vcmp.eq.s32.totalorder %v300_v22, %v2574_v10  ;;  %vm374_vm6 = vcmp.eq.s32.totalorder %v302_v23, %v2574_v10  ;;  %vm369_vm7 = vcmp.eq.s32.totalorder %v297_v24, %v2571_v7  ;;  %v286_v39 = vld [vmem:[#allocation8 + $0x10] sm:$0xff]  ;;  %v345_v40 = vld [vmem:[#allocation8 + $0x1e8] sm:$0xff] }
  0x85   : > { %vm1881_vm14 = vmpackc.low %vm379_vm11, %vm377_vm10  ;;  %vm371_vm8 = vcmp.eq.s32.totalorder %v299_v25, %v2571_v7  ;;  %vm368_vm11 = vcmp.eq.s32.totalorder %v296_v26, %v2574_v10  ;;  %vm370_vm12 = vcmp.eq.s32.totalorder %v298_v27, %v2574_v10  ;;  %v347_v41 = vld [vmem:[#allocation8 + $0x1f8] sm:$0xff]  ;;  %v344_v42 = vld [vmem:[#allocation8 + $0x1e0] sm:$0xff] }
  0x86   : > { %vm1883_vm3 = vmpackc.low %vm378_vm0, %vm376_vm15  ;;  %v346_v43 = vld [vmem:[#allocation8 + $0x1f0] sm:$0xff]  ;;  %v341_v44 = vld [vmem:[#allocation8 + $0x1c8] sm:$0xff] }
  0x87   : > { %1880 = vmatpush1.bf16.msk.msra.mxu0 %vm1879_vm13, %v2328_v17  ;;  %1960 = vmatpush1.bf16.msk.msra.mxu1 %vm1879_vm13, %v2328_v17  ;;  %vm1885_vm4 = vmpackc.low %vm375_vm2, %vm373_vm1  ;;  %vm365_vm13 = vcmp.eq.s32.totalorder %v293_v28, %v2571_v7  ;;  %vm364_vm1 = vcmp.eq.s32.totalorder %v292_v30, %v2574_v10  ;;  %vm366_vm2 = vcmp.eq.s32.totalorder %v294_v31, %v2574_v10  ;;  %v343_v45 = vld [vmem:[#allocation8 + $0x1d8] sm:$0xff]  ;;  %v340_v46 = vld [vmem:[#allocation8 + $0x1c0] sm:$0xff] }
  0x88   : > { %1882 = vmatprep.subr.msk.bf16.mxu0 %vm1881_vm14, %v2328_v17  ;;  %1945 = vmatprep.subr.msk.bf16.mxu1 %vm1881_vm14, %v2328_v17  ;;  %vm1887_vm9 = vmpackc.low %vm374_vm6, %vm372_vm5  ;;  %vm367_vm14 = vcmp.eq.s32.totalorder %v295_v29, %v2571_v7  ;;  %v2068_v47 = vld [vmem:[%s2547_s30 + $0x4] ss:$8 sps:$4 sm:$0xff]   ;;  %v337_v49 = vld [vmem:[#allocation8 + $0x1a8] sm:$0xff] }
  0x89   : > { %vm1889_vm10 = vmpackc.low %vm371_vm8, %vm369_vm7  ;;  %vm360_vm7 = vcmp.eq.s32.totalorder %v288_v34, %v2574_v10  ;;  %vm362_vm8 = vcmp.eq.s32.totalorder %v290_v35, %v2574_v10  ;;  %v342_v48 = vld [vmem:[#allocation8 + $0x1d0] sm:$0xff]  ;;  %v339_v50 = vld [vmem:[#allocation8 + $0x1b8] sm:$0xff]  ;;  %884 = vmatprep.mubr.bf16.mxu0 %v2068_v47 }
  0x8a   : > { %vm1891_vm15 = vmpackc.low %vm370_vm12, %vm368_vm11  ;;  %v2071_v51 = vld [vmem:[%s2547_s30 + $0xc4] ss:$8 sps:$4 sm:$0xff]   ;;  %v333_v54 = vld [vmem:[#allocation8 + $0x188] sm:$0xff] }
  0x8b   : > { %1884 = vmatpush1.bf16.msk.msra.mxu0 %vm1883_vm3, %v2328_v17  ;;  %1961 = vmatpush1.bf16.msk.msra.mxu1 %vm1883_vm3, %v2328_v17  ;;  %vm1893_vm0 = vmpackc.low %vm367_vm14, %vm365_vm13  ;;  %vm361_vm3 = vcmp.eq.s32.totalorder %v289_v32, %v2571_v7  ;;  %vm356_vm13 = vcmp.eq.s32.totalorder %v284_v38, %v2574_v10  ;;  %vm358_vm14 = vcmp.eq.s32.totalorder %v286_v39, %v2574_v10  ;;  %v336_v52 = vld [vmem:[#allocation8 + $0x1a0] sm:$0xff]  ;;  %v338_v53 = vld [vmem:[#allocation8 + $0x1b0] sm:$0xff] }
  0x8c   : > { %1886 = vmatprep.subr.msk.bf16.mxu0 %vm1885_vm4, %v2328_v17  ;;  %1946 = vmatprep.subr.msk.bf16.mxu1 %vm1885_vm4, %v2328_v17  ;;  %vm363_vm4 = vcmp.eq.s32.totalorder %v291_v33, %v2571_v7  ;;  %vm1895_vm5 = vmpackc.low %vm366_vm2, %vm364_vm1  ;;  %v335_v55 = vld [vmem:[#allocation8 + $0x198] sm:$0xff]  ;;  %v332_v56 = vld [vmem:[#allocation8 + $0x180] sm:$0xff] }
  0x8d   : > { %vm1897_vm6 = vmpackc.low %vm363_vm4, %vm361_vm3  ;;  %vm416_vm3 = vcmp.eq.s32.totalorder %v344_v42, %v2574_v10  ;;  %vm418_vm4 = vcmp.eq.s32.totalorder %v346_v43, %v2574_v10  ;;  %1004 = vmatprep.mubr.bf16.mxu1 %v2071_v51  ;;  %v334_v57 = vld [vmem:[#allocation8 + $0x190] sm:$0xff]  ;;  %v329_v58 = vld [vmem:[#allocation8 + $0x168] sm:$0xff] }
  0x8e   : > { %vm1899_vm11 = vmpackc.low %vm362_vm8, %vm360_vm7  ;;  %v331_v59 = vld [vmem:[#allocation8 + $0x178] sm:$0xff]  ;;  %v328_v60 = vld [vmem:[#allocation8 + $0x160] sm:$0xff] }
  0x8f   : > { %1888 = vmatpush1.bf16.msk.msra.mxu0 %vm1887_vm9, %v2328_v17  ;;  %1962 = vmatpush1.bf16.msk.msra.mxu1 %vm1887_vm9, %v2328_v17  ;;  %vm357_vm9 = vcmp.eq.s32.totalorder %v285_v36, %v2571_v7  ;;  %vm1903_vm1 = vmpackc.low %vm358_vm14, %vm356_vm13  ;;  %v330_v61 = vld [vmem:[#allocation8 + $0x170] sm:$0xff]  ;;  %v325_v62 = vld [vmem:[#allocation8 + $0x148] sm:$0xff] }
  0x90   : > { %1890 = vmatprep.subr.msk.bf16.mxu0 %vm1889_vm10, %v2328_v17  ;;  %1947 = vmatprep.subr.msk.bf16.mxu1 %vm1889_vm10, %v2328_v17  ;;  %vm359_vm10 = vcmp.eq.s32.totalorder %v287_v37, %v2571_v7  ;;  %vm1907_vm7 = vmpackc.low %vm418_vm4, %vm416_vm3  ;;  %v327_v63 = vld [vmem:[#allocation8 + $0x158] sm:$0xff]  ;;  %v324_v4 = vld [vmem:[#allocation8 + $0x140] sm:$0xff] }
  0x91   : > { %vm1901_vm12 = vmpackc.low %vm359_vm10, %vm357_vm9  ;;  %vm412_vm9 = vcmp.eq.s32.totalorder %v340_v46, %v2574_v10  ;;  %vm414_vm10 = vcmp.eq.s32.totalorder %v342_v48, %v2574_v10  ;;  %v326_v5 = vld [vmem:[#allocation8 + $0x150] sm:$0xff]  ;;  %v321_v6 = vld [vmem:[#allocation8 + $0x128] sm:$0xff] }
  0x92   : > { %vm1911_vm13 = vmpackc.low %vm414_vm10, %vm412_vm9  ;;  %v323_v8 = vld [vmem:[#allocation8 + $0x138] sm:$0xff]  ;;  %v320_v9 = vld [vmem:[#allocation8 + $0x120] sm:$0xff] }
  0x93   : > { %1892 = vmatpush1.bf16.msk.msra.mxu0 %vm1891_vm15, %v2328_v17  ;;  %1963 = vmatpush1.bf16.msk.msra.mxu1 %vm1891_vm15, %v2328_v17  ;;  %vm417_vm15 = vcmp.eq.s32.totalorder %v345_v40, %v2571_v7  ;;  %v322_v11 = vld [vmem:[#allocation8 + $0x130] sm:$0xff]  ;;  %v317_v12 = vld [vmem:[#allocation8 + $0x108] sm:$0xff]  ;;  %v319_v13 = vld [vmem:[#allocation8 + $0x118] sm:$0xff] }
  0x94   : > { %1894 = vmatprep.subr.msk.bf16.mxu0 %vm1893_vm0, %v2328_v17  ;;  %1948 = vmatprep.subr.msk.bf16.mxu1 %vm1893_vm0, %v2328_v17  ;;  %vm419_vm0 = vcmp.eq.s32.totalorder %v347_v41, %v2571_v7  ;;  %v316_v14 = vld [vmem:[#allocation8 + $0x100] sm:$0xff]  ;;  %v318_v15 = vld [vmem:[#allocation8 + $0x110] sm:$0xff] }
  0x95   : > { %vm1905_vm2 = vmpackc.low %vm419_vm0, %vm417_vm15  ;;  %vm408_vm15 = vcmp.eq.s32.totalorder %v336_v52, %v2574_v10  ;;  %vm410_vm0 = vcmp.eq.s32.totalorder %v338_v53, %v2574_v10  ;;  %v2069_v16 = vld [vmem:[%s2547_s30 + $0xc0] ss:$8 sps:$4 sm:$0xff]   ;;  %v2074_v18 = vld [vmem:[%s2547_s30 + $0xd4] ss:$8 sps:$4 sm:$0xff]  }
  0x96   : > { %vm1915_vm3 = vmpackc.low %vm410_vm0, %vm408_vm15  ;;  %v2076_v19 = vld [vmem:[%s2547_s30 + $0x10] ss:$8 sps:$4 sm:$0xff]   ;;  %v2078_v21 = vld [vmem:[%s2547_s30 + $0x24] ss:$8 sps:$4 sm:$0xff]  }
  0x97   : > { %1896 = vmatpush1.bf16.msk.msra.mxu0 %vm1895_vm5, %v2328_v17  ;;  %1964 = vmatpush1.bf16.msk.msra.mxu1 %vm1895_vm5, %v2328_v17  ;;  %vm413_vm5 = vcmp.eq.s32.totalorder %v341_v44, %v2571_v7  ;;  %v2077_v20 = vld [vmem:[%s2547_s30 + $0xd0] ss:$8 sps:$4 sm:$0xff]   ;;  %v2080_v22 = vld [vmem:[%s2547_s30 + $0xe4] ss:$8 sps:$4 sm:$0xff]   ;;  %v2083_v23 = vld [vmem:[%s2547_s30 + $0xe0] ss:$8 sps:$4 sm:$0xff]  }
  0x98   : > { %1898 = vmatprep.subr.msk.bf16.mxu0 %vm1897_vm6, %v2328_v17  ;;  %1949 = vmatprep.subr.msk.bf16.mxu1 %vm1897_vm6, %v2328_v17  ;;  %vm415_vm6 = vcmp.eq.s32.totalorder %v343_v45, %v2571_v7  ;;  %v2084_v24 = vld [vmem:[%s2547_s30 + $0x34] ss:$8 sps:$4 sm:$0xff]   ;;  %v2088_v26 = vld [vmem:[%s2547_s30 + $0x30] ss:$8 sps:$4 sm:$0xff]   ;;  %v2090_v28 = vld [vmem:[%s2547_s30 + $0x44] ss:$8 sps:$4 sm:$0xff]  }
  0x99   : > { %vm1909_vm8 = vmpackc.low %vm415_vm6, %vm413_vm5  ;;  %vm404_vm5 = vcmp.eq.s32.totalorder %v332_v56, %v2574_v10  ;;  %vm406_vm6 = vcmp.eq.s32.totalorder %v334_v57, %v2574_v10  ;;  %v2086_v25 = vld [vmem:[%s2547_s30 + $0xf4] ss:$8 sps:$4 sm:$0xff]   ;;  %v2089_v27 = vld [vmem:[%s2547_s30 + $0xf0] ss:$8 sps:$4 sm:$0xff]  }
  0x9a   : > { %vm1919_vm9 = vmpackc.low %vm406_vm6, %vm404_vm5  ;;  %v2092_v29 = vld [vmem:[%s2547_s30 + $0x104] ss:$8 sps:$4 sm:$0xff]   ;;  %v2094_v30 = vld [vmem:[%s2547_s30 + $0x40] ss:$8 sps:$4 sm:$0xff]  }
  0x9b   : > { %1900 = vmatpush1.bf16.msk.msra.mxu0 %vm1899_vm11, %v2328_v17  ;;  %1965 = vmatpush1.bf16.msk.msra.mxu1 %vm1899_vm11, %v2328_v17  ;;  %vm409_vm11 = vcmp.eq.s32.totalorder %v337_v49, %v2571_v7  ;;  %v2095_v31 = vld [vmem:[%s2547_s30 + $0x100] ss:$8 sps:$4 sm:$0xff]   ;;  %v2096_v32 = vld [vmem:[%s2547_s30 + $0x54] ss:$8 sps:$4 sm:$0xff]   ;;  %v2098_v34 = vld [vmem:[%s2547_s30 + $0x50] ss:$8 sps:$4 sm:$0xff]  }
  0x9c   : > { %1902 = vmatprep.subr.msk.bf16.mxu0 %vm1901_vm12, %v2328_v17  ;;  %1950 = vmatprep.subr.msk.bf16.mxu1 %vm1901_vm12, %v2328_v17  ;;  %vm411_vm12 = vcmp.eq.s32.totalorder %v339_v50, %v2571_v7  ;;  %v2099_v33 = vld [vmem:[%s2547_s30 + $0x114] ss:$8 sps:$4 sm:$0xff]   ;;  %v2101_v35 = vld [vmem:[%s2547_s30 + $0x110] ss:$8 sps:$4 sm:$0xff]   ;;  %v2102_v36 = vld [vmem:[%s2547_s30 + $0x64] ss:$8 sps:$4 sm:$0xff]  }
  0x9d   : > { %vm1913_vm14 = vmpackc.low %vm411_vm12, %vm409_vm11  ;;  %vm400_vm11 = vcmp.eq.s32.totalorder %v328_v60, %v2574_v10  ;;  %vm402_vm12 = vcmp.eq.s32.totalorder %v330_v61, %v2574_v10  ;;  %v2104_v37 = vld [vmem:[%s2547_s30 + $0x124] ss:$8 sps:$4 sm:$0xff]   ;;  %v2106_v38 = vld [vmem:[%s2547_s30 + $0x60] ss:$8 sps:$4 sm:$0xff]  }
  0x9e   : > { %vm1923_vm15 = vmpackc.low %vm402_vm12, %vm400_vm11  ;;  %v2107_v39 = vld [vmem:[%s2547_s30 + $0x120] ss:$8 sps:$4 sm:$0xff]   ;;  %v2108_v40 = vld [vmem:[%s2547_s30 + $0x74] ss:$8 sps:$4 sm:$0xff]  }
  0x9f   : > { %1904 = vmatpush1.bf16.msk.msra.mxu0 %vm1903_vm1, %v2328_v17  ;;  %1966 = vmatpush1.bf16.msk.msra.mxu1 %vm1903_vm1, %v2328_v17  ;;  %vm405_vm1 = vcmp.eq.s32.totalorder %v333_v54, %v2571_v7  ;;  %v2110_v41 = vld [vmem:[%s2547_s30 + $0x134] ss:$8 sps:$4 sm:$0xff]   ;;  %v2112_v42 = vld [vmem:[%s2547_s30 + $0x70] ss:$8 sps:$4 sm:$0xff]   ;;  %v2114_v44 = vld [vmem:[%s2547_s30 + $0x84] ss:$8 sps:$4 sm:$0xff]  }
  0xa0   : > { %1906 = vmatprep.subr.msk.bf16.mxu0 %vm1905_vm2, %v2328_v17  ;;  %1951 = vmatprep.subr.msk.bf16.mxu1 %vm1905_vm2, %v2328_v17  ;;  %vm407_vm2 = vcmp.eq.s32.totalorder %v335_v55, %v2571_v7  ;;  %v2113_v43 = vld [vmem:[%s2547_s30 + $0x130] ss:$8 sps:$4 sm:$0xff]   ;;  %v2116_v45 = vld [vmem:[%s2547_s30 + $0x144] ss:$8 sps:$4 sm:$0xff]   ;;  %v2118_v46 = vld [vmem:[%s2547_s30 + $0x80] ss:$8 sps:$4 sm:$0xff]  }
  0xa1   : > { %vm1917_vm4 = vmpackc.low %vm407_vm2, %vm405_vm1  ;;  %vm396_vm1 = vcmp.eq.s32.totalorder %v324_v4, %v2574_v10  ;;  %vm398_vm2 = vcmp.eq.s32.totalorder %v326_v5, %v2574_v10  ;;  %v2119_v47 = vld [vmem:[%s2547_s30 + $0x140] ss:$8 sps:$4 sm:$0xff]   ;;  %v2120_v48 = vld [vmem:[%s2547_s30 + $0x94] ss:$8 sps:$4 sm:$0xff]  }
  0xa2   : > { %vm1927_vm5 = vmpackc.low %vm398_vm2, %vm396_vm1  ;;  %v2122_v49 = vld [vmem:[%s2547_s30 + $0x154] ss:$8 sps:$4 sm:$0xff]   ;;  %v624_v50 = vld [vmem:[%s2547_s30 + $0x160] sm:$0xff] }
  0xa3   : > { %1908 = vmatpush2.bf16.msk.msra.mxu0 %vm1907_vm7, %v2328_v17  ;;  %1967 = vmatpush2.bf16.msk.msra.mxu1 %vm1907_vm7, %v2328_v17  ;;  %vm401_vm7 = vcmp.eq.s32.totalorder %v329_v58, %v2571_v7  ;;  %v2124_v51 = vld [vmem:[%s2547_s30 + $0x90] ss:$8 sps:$4 sm:$0xff]   ;;  %v1872_v53 = vcombine.high %v624_v50, %v624_v50  ;;  %v1871_v54 = vcombine.low %v624_v50, %v624_v50  ;;  %v2128_v55 = vld [vmem:[%s2547_s30 + $0xa4] ss:$8 sps:$4 sm:$0xff]   ;;  %v2130_v56 = vld [vmem:[%s2547_s30 + $0xa0] ss:$8 sps:$4 sm:$0xff]  }
  0xa4   : > { %1910 = vmatprep.subr.msk.bf16.mxu0 %vm1909_vm8, %v2328_v17  ;;  %1952 = vmatprep.subr.msk.bf16.mxu1 %vm1909_vm8, %v2328_v17  ;;  %vm403_vm8 = vcmp.eq.s32.totalorder %v331_v59, %v2571_v7  ;;  %v2125_v52 = vld [vmem:[%s2547_s30 + $0x150] ss:$8 sps:$4 sm:$0xff]   ;;  %v2131_v57 = vld [vmem:[%s2547_s30 + $0xb4] ss:$8 sps:$4 sm:$0xff]  }
  0xa5   : > { %vm1921_vm10 = vmpackc.low %vm403_vm8, %vm401_vm7  ;;  %vm392_vm7 = vcmp.eq.s32.totalorder %v320_v9, %v2574_v10  ;;  %vm394_vm8 = vcmp.eq.s32.totalorder %v322_v11, %v2574_v10  ;;  %v2133_v58 = vld [vmem:[%s2547_s30 + $0xb0] ss:$8 sps:$4 sm:$0xff]  }
  0xa6   : > { %vm1931_vm11 = vmpackc.low %vm394_vm8, %vm392_vm7 }
  0xa7   : > { %1912 = vmatpush2.bf16.msk.msra.mxu0 %vm1911_vm13, %v2328_v17  ;;  %1968 = vmatpush2.bf16.msk.msra.mxu1 %vm1911_vm13, %v2328_v17  ;;  %vm397_vm13 = vcmp.eq.s32.totalorder %v325_v62, %v2571_v7 }
  0xa8   : > { %1914 = vmatprep.subr.msk.bf16.mxu0 %vm1913_vm14, %v2328_v17  ;;  %1953 = vmatprep.subr.msk.bf16.mxu1 %vm1913_vm14, %v2328_v17  ;;  %vm399_vm14 = vcmp.eq.s32.totalorder %v327_v63, %v2571_v7 }
  0xa9   : > { %vm1925_vm0 = vmpackc.low %vm399_vm14, %vm397_vm13  ;;  %vm388_vm13 = vcmp.eq.s32.totalorder %v316_v14, %v2574_v10  ;;  %vm390_vm14 = vcmp.eq.s32.totalorder %v318_v15, %v2574_v10  ;;  %v2072_v10 = vld [vmem:[%s2547_s30 + $0x14] ss:$8 sps:$4 sm:$0xff]  }
  0xab   : > { %1916 = vmatpush2.bf16.msk.msra.mxu0 %vm1915_vm3, %v2328_v17  ;;  %1969 = vmatpush2.bf16.msk.msra.mxu1 %vm1915_vm3, %v2328_v17  ;;  %vm393_vm3 = vcmp.eq.s32.totalorder %v321_v6, %v2571_v7 }
  0xac   : > { %1918 = vmatprep.subr.msk.bf16.mxu0 %vm1917_vm4, %v2328_v17  ;;  %1954 = vmatprep.subr.msk.bf16.mxu1 %vm1917_vm4, %v2328_v17  ;;  %vm395_vm4 = vcmp.eq.s32.totalorder %v323_v8, %v2571_v7 }
  0xad   : > { %vm1929_vm6 = vmpackc.low %vm395_vm4, %vm393_vm3 }
  0xaf   : > { %1920 = vmatpush2.bf16.msk.msra.mxu0 %vm1919_vm9, %v2328_v17  ;;  %1970 = vmatpush2.bf16.msk.msra.mxu1 %vm1919_vm9, %v2328_v17  ;;  %vm389_vm9 = vcmp.eq.s32.totalorder %v317_v12, %v2571_v7 }
  0xb0   : > { %1922 = vmatprep.subr.msk.bf16.mxu0 %vm1921_vm10, %v2328_v17  ;;  %1955 = vmatprep.subr.msk.bf16.mxu1 %vm1921_vm10, %v2328_v17  ;;  %vm391_vm10 = vcmp.eq.s32.totalorder %v319_v13, %v2571_v7  ;;  %v2066_v7 = vld [vmem:[%s2547_s30] ss:$8 sps:$4 sm:$0xff]  }
  0xb1   : > { %vm1933_vm12 = vmpackc.low %vm391_vm10, %vm389_vm9 }
  0xb3   : > { %1924 = vmatpush2.bf16.msk.msra.mxu0 %vm1923_vm15, %v2328_v17  ;;  %1971 = vmatpush2.bf16.msk.msra.mxu1 %vm1923_vm15, %v2328_v17  ;;  %vm1935_vm15 = vmpackc.low %vm390_vm14, %vm388_vm13 }
  0xb4   : > { %1926 = vmatprep.subr.msk.bf16.mxu0 %vm1925_vm0, %v2328_v17  ;;  %1956 = vmatprep.subr.msk.bf16.mxu1 %vm1925_vm0, %v2328_v17 }
  0xb7   : > { %1928 = vmatpush2.bf16.msk.msra.mxu0 %vm1927_vm5, %v2328_v17  ;;  %1972 = vmatpush2.bf16.msk.msra.mxu1 %vm1927_vm5, %v2328_v17 }
  0xb8   : > { %1930 = vmatprep.subr.msk.bf16.mxu0 %vm1929_vm6, %v2328_v17  ;;  %1957 = vmatprep.subr.msk.bf16.mxu1 %vm1929_vm6, %v2328_v17 }
  0xbb   : > { %1932 = vmatpush2.bf16.msk.msra.mxu0 %vm1931_vm11, %v2328_v17  ;;  %1973 = vmatpush2.bf16.msk.msra.mxu1 %vm1931_vm11, %v2328_v17 }
  0xbc   : > { %1934 = vmatprep.subr.msk.bf16.mxu0 %vm1933_vm12, %v2328_v17  ;;  %1958 = vmatprep.subr.msk.bf16.mxu1 %vm1933_vm12, %v2328_v17 }
  0xbf   : > { %1936 = vmatpush2.bf16.msk.msra.mxu0 %vm1935_vm15, %v2328_v17  ;;  %1974 = vmatpush2.bf16.msk.msra.mxu1 %vm1935_vm15, %v2328_v17  ;;  %v2082_v17 = vld [vmem:[%s2547_s30 + $0x20] ss:$8 sps:$4 sm:$0xff]   ;;  %s2242_s30 = scalar_lea.vmem %s3417_s7, 1280 }
  0xc0   : > { %p2243_p12 = scmp.ne.s32.totalorder %s3417_s7, %s2242_s30 }
  0xc2   : > { %885 = vmatmul.mubr.bf16.vlgmr.msra.gmra.mxu0 %v2066_v7  ;;  %1005 = vmatmul.mubr.bf16.vlgmr.msra.gmra.mxu1 %v2069_v16  ;;  %p2244_p9 = pnand %p2243_p12, %p3513_p7 }
  0xc3   : > { %894 = vmatprep.mubr.bf16.mxu0 %v2072_v10  ;;  %1014 = vmatprep.mubr.bf16.mxu1 %v2074_v18 }
  0xc4   : > { %p2245_p13 = pneg %p2244_p9 }
  0xca   : > { %895 = vmatmul.mubr.bf16.gmra.mxu0 %v2076_v19  ;;  %1015 = vmatmul.mubr.bf16.gmra.mxu1 %v2077_v20 }
  0xcb   : > { %904 = vmatprep.mubr.bf16.mxu0 %v2078_v21  ;;  %1024 = vmatprep.mubr.bf16.mxu1 %v2080_v22 }
  0xd2   : > { %905 = vmatmul.mubr.bf16.gmra.mxu0 %v2082_v17  ;;  %1025 = vmatmul.mubr.bf16.gmra.mxu1 %v2083_v23 }
  0xd3   : > { %914 = vmatprep.mubr.bf16.mxu0 %v2084_v24  ;;  %1034 = vmatprep.mubr.bf16.mxu1 %v2086_v25 }
  0xda   : > { %915 = vmatmul.mubr.bf16.gmra.mxu0 %v2088_v26  ;;  %1035 = vmatmul.mubr.bf16.gmra.mxu1 %v2089_v27 }
  0xdb   : > { %924 = vmatprep.mubr.bf16.mxu0 %v2090_v28  ;;  %1044 = vmatprep.mubr.bf16.mxu1 %v2092_v29 }
  0xe2   : > { %925 = vmatmul.mubr.bf16.gmra.mxu0 %v2094_v30  ;;  %1045 = vmatmul.mubr.bf16.gmra.mxu1 %v2095_v31 }
  0xe3   : > { %934 = vmatprep.mubr.bf16.mxu0 %v2096_v32  ;;  %1054 = vmatprep.mubr.bf16.mxu1 %v2099_v33 }
  0xea   : > { %935 = vmatmul.mubr.bf16.gmra.mxu0 %v2098_v34  ;;  %1055 = vmatmul.mubr.bf16.gmra.mxu1 %v2101_v35 }
  0xeb   : > { %944 = vmatprep.mubr.bf16.mxu0 %v2102_v36  ;;  %1064 = vmatprep.mubr.bf16.mxu1 %v2104_v37 }
  0xf2   : > { %945 = vmatmul.mubr.bf16.gmra.mxu0 %v2106_v38  ;;  %1065 = vmatmul.mubr.bf16.gmra.mxu1 %v2107_v39 }
  0xf3   : > { %954 = vmatprep.mubr.bf16.mxu0 %v2108_v40  ;;  %1074 = vmatprep.mubr.bf16.mxu1 %v2110_v41 }
  0xfa   : > { %955 = vmatmul.mubr.bf16.gmra.mxu0 %v2112_v42  ;;  %1075 = vmatmul.mubr.bf16.gmra.mxu1 %v2113_v43 }
  0xfb   : > { %964 = vmatprep.mubr.bf16.mxu0 %v2114_v44  ;;  %1084 = vmatprep.mubr.bf16.mxu1 %v2116_v45 }
 0x102   : > { %965 = vmatmul.mubr.bf16.gmra.mxu0 %v2118_v46  ;;  %1085 = vmatmul.mubr.bf16.gmra.mxu1 %v2119_v47 }
 0x103   : > { %974 = vmatprep.mubr.bf16.mxu0 %v2120_v48  ;;  %1094 = vmatprep.mubr.bf16.mxu1 %v2122_v49 }
 0x10a   : > { %975 = vmatmul.mubr.bf16.gmra.mxu0 %v2124_v51  ;;  %1095 = vmatmul.mubr.bf16.gmra.mxu1 %v2125_v52 }
 0x10b   : > { %1104 = vmatprep.mubr.bf16.mxu1 %v1872_v53  ;;  %984 = vmatprep.mubr.bf16.mxu0 %v2128_v55 }
 0x112   : > { %1105 = vmatmul.mubr.bf16.gmra.mxu1 %v1871_v54  ;;  %985 = vmatmul.mubr.bf16.gmra.mxu0 %v2130_v56 }
 0x113   : > { %994 = vmatprep.mubr.bf16.mxu0 %v2131_v57 }
 0x11a   : > { %995 = vmatmul.mubr.bf16.gmra.mxu0 %v2133_v58 }
 0x182   : > { %v886_v59 = vpop.f32.mrf.mxu0  ;;  %v2753_v60 = vpop.f32.mrf.mxu1 }
 0x183   : > { %3489 = vst [vmem:[#allocation16_spill] sm:$0xff] %v2753_v60  ;;  %1117 = vrot.lane.b32.xlu0 %v886_v59, %s2329_s21 }
 0x184   : > { %v888_v61 = vpop.f32.mrf.mxu0  ;;  %v2756_v62 = vpop.f32.mrf.mxu1 }
 0x185   : > { %3490 = vst [vmem:[#allocation17_spill] sm:$0xff] %v2756_v62  ;;  %1127 = vrot.lane.b32.xlu1 %v888_v61, %s2329_s21 }
 0x186   : > { %v890_v63 = vpop.f32.mrf.mxu0  ;;  %v1010_v4 = vpop.f32.mrf.mxu1 }
 0x187   : > { %1119 = vrot.lane.b32.xlu0 %v890_v63, %s2329_s21 }
 0x188   : > { %v892_v5 = vpop.f32.mrf.mxu0  ;;  %v1012_v6 = vpop.f32.mrf.mxu1 }
 0x189   : > { %1375 = vrot.lane.b32.xlu1 %v1012_v6, %s2330_s12 }
 0x18a   : > { %v1016_v8 = vpop.f32.mrf.mxu1  ;;  %v896_v9 = vpop.f32.mrf.mxu0 }
 0x18b   : > { %1365 = vrot.lane.b32.xlu0 %v1010_v4, %s2330_s12 }
 0x18c   : > { %v1018_v11 = vpop.f32.mrf.mxu1  ;;  %v898_v14 = vpop.f32.mrf.mxu0 }
 0x18d   : > { %1121 = vrot.lane.b32.xlu1 %v896_v9, %s2329_s21 }
 0x18e   : > { %v1020_v12 = vpop.f32.mrf.mxu1  ;;  %v900_v16 = vpop.f32.mrf.mxu0 }
 0x18f   : > { %1129 = vrot.lane.b32.xlu0 %v892_v5, %s2329_s21 }
 0x190   : > { %v1022_v13 = vpop.f32.mrf.mxu1  ;;  %v902_v19 = vpop.f32.mrf.mxu0 }
 0x191   : > { %1367 = vrot.lane.b32.xlu1 %v1016_v8, %s2330_s12 }
 0x192   : > { %v1026_v15 = vpop.f32.mrf.mxu1  ;;  %v906_v21 = vpop.f32.mrf.mxu0 }
 0x193   : > { %1377 = vrot.lane.b32.xlu0 %v1018_v11, %s2330_s12 }
 0x194   : > { %v1028_v7 = vpop.f32.mrf.mxu1  ;;  %v908_v23 = vpop.f32.mrf.mxu0 }
 0x195   : > { %1131 = vrot.lane.b32.xlu1 %v898_v14, %s2329_s21 }
 0x196   : > { %v1030_v10 = vpop.f32.mrf.mxu1  ;;  %v910_v26 = vpop.f32.mrf.mxu0 }
 0x197   : > { %1369 = vrot.lane.b32.xlu0 %v1020_v12, %s2330_s12 }
 0x198   : > { %v1032_v18 = vpop.f32.mrf.mxu1  ;;  %v912_v29 = vpop.f32.mrf.mxu0 }
 0x199   : > { %1123 = vrot.lane.b32.xlu1 %v900_v16, %s2329_s21  ;;  %v2838_v16 = vand.u32 127, %v348_v0 }
 0x19a   : > { %v1036_v20 = vpop.f32.mrf.mxu1  ;;  %v916_v33 = vpop.f32.mrf.mxu0 }
 0x19b   : > { %1133 = vrot.lane.b32.xlu0 %v902_v19, %s2329_s21  ;;  %vm1139_vm0 = vcmp.lt.s32.totalorder %v2838_v16, 111  ;;  %vm1385_vm1 = vcmp.lt.s32.totalorder %v2838_v16, 1  ;;  %vm1198_vm2 = vcmp.lt.s32.totalorder %v2838_v16, 112  ;;  %vm1444_vm3 = vcmp.lt.s32.totalorder %v2838_v16, 15 }
 0x19c   : > { %v1038_v22 = vpop.f32.mrf.mxu1  ;;  %v918_v36 = vpop.f32.mrf.mxu0  ;;  %vm1257_vm4 = vcmp.lt.s32.totalorder %v2838_v16, 113  ;;  %vm1316_vm5 = vcmp.lt.s32.totalorder %v2838_v16, 127  ;;  %vm1503_vm6 = vcmp.lt.s32.totalorder %v2838_v16, 16  ;;  %vm1562_vm7 = vcmp.lt.s32.totalorder %v2838_v16, 17 }
 0x19d   : > { %1379 = vrot.lane.b32.xlu1 %v1022_v13, %s2330_s12 }
 0x19e   : > { %v1040_v17 = vpop.f32.mrf.mxu1  ;;  %v920_v39 = vpop.f32.mrf.mxu0 }
 0x19f   : > { %1125 = vrot.lane.b32.xlu0 %v906_v21, %s2329_s21 }
 0x1a0   : > { %v1042_v24 = vpop.f32.mrf.mxu1  ;;  %v922_v43 = vpop.f32.mrf.mxu0 }
 0x1a1   : > { %1371 = vrot.lane.b32.xlu1 %v1026_v15, %s2330_s12 }
 0x1a2   : > { %v1046_v25 = vpop.f32.mrf.mxu1  ;;  %v926_v45 = vpop.f32.mrf.mxu0 }
 0x1a3   : > { %1381 = vrot.lane.b32.xlu0 %v1028_v7, %s2330_s12 }
 0x1a4   : > { %v1048_v27 = vpop.f32.mrf.mxu1  ;;  %v928_v48 = vpop.f32.mrf.mxu0 }
 0x1a5   : > { %1135 = vrot.lane.b32.xlu1 %v908_v23, %s2329_s21  ;;  %s2337_s21 = smov [#allocation10]  }
 0x1a6   : > { %v1050_v28 = vpop.f32.mrf.mxu1  ;;  %v930_v51 = vpop.f32.mrf.mxu0 }
 0x1a7   : > { %1178 = vrot.lane.b32.xlu0 %v910_v26, %s2331_s9 }
 0x1a8   : > { %v1052_v30 = vpop.f32.mrf.mxu1  ;;  %v932_v54 = vpop.f32.mrf.mxu0 }
 0x1a9   : > { %1188 = vrot.lane.b32.xlu1 %v912_v29, %s2331_s9 }
 0x1aa   : > { %v1056_v31 = vpop.f32.mrf.mxu1  ;;  %v936_v56 = vpop.f32.mrf.mxu0 }
 0x1ab   : > { %1373 = vrot.lane.b32.xlu0 %v1030_v10, %s2330_s12 }
 0x1ac   : > { %v1058_v32 = vpop.f32.mrf.mxu1  ;;  %v938_v59 = vpop.f32.mrf.mxu0 }
 0x1ad   : > { %1383 = vrot.lane.b32.xlu1 %v1032_v18, %s2330_s12  ;;  %s2246_s12 = sshll.u32 %s2337_s21, 4  ;;  %s2247_s12 = int_to_ptr.vmem [resolvable:$false] %s2246_s12 }
 0x1ae   : > { %v1060_v34 = vpop.f32.mrf.mxu1  ;;  %v940_v5 = vpop.f32.mrf.mxu0  ;;  %p2249_p5 = scmp.lt.s32.totalorder %s3417_s7, %s2247_s12 }
 0x1af   : > { %1424 = vrot.lane.b32.xlu0 %v1036_v20, %s2332_s8 }
 0x1b0   : > { %v1062_v35 = vpop.f32.mrf.mxu1  ;;  %v942_v9 = vpop.f32.mrf.mxu0 }
 0x1b1   : > { %1180 = vrot.lane.b32.xlu1 %v916_v33, %s2331_s9 }
 0x1b2   : > { %v1066_v37 = vpop.f32.mrf.mxu1  ;;  %v946_v11 = vpop.f32.mrf.mxu0 }
 0x1b3   : > { %1190 = vrot.lane.b32.xlu0 %v918_v36, %s2331_s9 }
 0x1b4   : > { %v1068_v38 = vpop.f32.mrf.mxu1  ;;  %v948_v12 = vpop.f32.mrf.mxu0 }
 0x1b5   : > { %1434 = vrot.lane.b32.xlu1 %v1038_v22, %s2332_s8 }
 0x1b6   : > { %v1070_v40 = vpop.f32.mrf.mxu1  ;;  %v950_v13 = vpop.f32.mrf.mxu0 }
 0x1b7   : > { %1182 = vrot.lane.b32.xlu0 %v920_v39, %s2331_s9 }
 0x1b8   : > { %v1072_v41 = vpop.f32.mrf.mxu1  ;;  %v952_v14 = vpop.f32.mrf.mxu0 }
 0x1b9   : > { %1426 = vrot.lane.b32.xlu1 %v1040_v17, %s2332_s8 }
 0x1ba   : > { %v1076_v42 = vpop.f32.mrf.mxu1  ;;  %v956_v15 = vpop.f32.mrf.mxu0 }
 0x1bb   : > { %1436 = vrot.lane.b32.xlu0 %v1042_v24, %s2332_s8 }
 0x1bc   : > { %v1078_v44 = vpop.f32.mrf.mxu1  ;;  %v958_v7 = vpop.f32.mrf.mxu0 }
 0x1bd   : > { %1192 = vrot.lane.b32.xlu1 %v922_v43, %s2331_s9 }
 0x1be   : > { %v2787_v46 = vpop.f32.mrf.mxu1  ;;  %v960_v10 = vpop.f32.mrf.mxu0 }
 0x1bf   : > { %1428 = vrot.lane.b32.xlu0 %v1046_v25, %s2332_s8 }
 0x1c0   : > { %v2790_v47 = vpop.f32.mrf.mxu1  ;;  %v962_v20 = vpop.f32.mrf.mxu0 }
 0x1c1   : > { %1184 = vrot.lane.b32.xlu1 %v926_v45, %s2331_s9 }
 0x1c2   : > { %v2793_v49 = vpop.f32.mrf.mxu1  ;;  %v966_v17 = vpop.f32.mrf.mxu0 }
 0x1c3   : > { %1194 = vrot.lane.b32.xlu0 %v928_v48, %s2331_s9 }
 0x1c4   : > { %v2796_v50 = vpop.f32.mrf.mxu1  ;;  %v968_v25 = vpop.f32.mrf.mxu0 }
 0x1c5   : > { %1438 = vrot.lane.b32.xlu1 %v1048_v27, %s2332_s8 }
 0x1c6   : > { %v2799_v52 = vpop.f32.mrf.mxu1 }
 0x1c7   : > { %1186 = vrot.lane.b32.xlu0 %v930_v51, %s2331_s9 }
 0x1c8   : > { %v2802_v53 = vpop.f32.mrf.mxu1 }
 0x1c9   : > { %1430 = vrot.lane.b32.xlu1 %v1050_v28, %s2332_s8 }
 0x1ca   : > { %v2805_v55 = vpop.f32.mrf.mxu1 }
 0x1cb   : > { %1440 = vrot.lane.b32.xlu0 %v1052_v30, %s2332_s8  ;;  %v970_v30 = vpop.f32.mrf.mxu0 }
 0x1cc   : > { %v2808_v57 = vpop.f32.mrf.mxu1 }
 0x1cd   : > { %1196 = vrot.lane.b32.xlu1 %v932_v54, %s2331_s9  ;;  %s2248_s9 = scalar_lea.vmem %s2247_s12, 2560 }
 0x1ce   : > { %v2811_v58 = vpop.f32.mrf.mxu1  ;;  %p2250_p1 = scmp.lt.s32.totalorder %s2248_s9, %s2242_s30 }
 0x1cf   : > { %1237 = vrot.lane.b32.xlu0 %v936_v56, %s2333_s10 }
 0x1d0   : > { %v2814_v61 = vpop.f32.mrf.mxu1  ;;  %p2251_p4 = por %p2250_p1, %p2249_p5 }
 0x1d1   : > { %1247 = vrot.lane.b32.xlu1 %v938_v59, %s2333_s10  ;;  %v2921_v59 = vld [vmem:[#allocation7] sm:$0xff] }
 0x1d2   : > { %v2817_v63 = vpop.f32.mrf.mxu1  ;;  %p2252_p3 = pnand %p2251_p4, %p2245_p13 }
 0x1d3   : > { %1432 = vrot.lane.b32.xlu0 %v1056_v31, %s2332_s8 }
 0x1d4   : > { %v2820_v4 = vpop.f32.mrf.mxu1 }
 0x1d5   : > { %1442 = vrot.lane.b32.xlu1 %v1058_v32, %s2332_s8 }
 0x1d6   : > { %v1110_v6 = vpop.f32.mrf.mxu1 }
 0x1d7   : > { %1483 = vrot.lane.b32.xlu0 %v1060_v34, %s2334_s25  ;;  %v2924_v6 = vld [vmem:[#allocation7 + $0x8] sm:$0xff] }
 0x1d8   : > { %v1111_v8 = vpop.f32.mrf.mxu1 }
 0x1d9   : > { %1239 = vrot.lane.b32.xlu1 %v940_v5, %s2333_s10 }
 0x1db   : > { %1249 = vrot.lane.b32.xlu0 %v942_v9, %s2333_s10 }
 0x1dd   : > { %1493 = vrot.lane.b32.xlu1 %v1062_v35, %s2334_s25  ;;  %v972_v35 = vpop.f32.mrf.mxu0 }
 0x1df   : > { %1241 = vrot.lane.b32.xlu0 %v946_v11, %s2333_s10  ;;  %v976_v39 = vpop.f32.mrf.mxu0  ;;  %v2938_v11 = vrot.slane %v2921_v59, %v2568_v3 }
 0x1e1   : > { %1485 = vrot.lane.b32.xlu1 %v1066_v37, %s2334_s25 }
 0x1e3   : > { %1495 = vrot.lane.b32.xlu0 %v1068_v38, %s2334_s25 }
 0x1e5   : > { %1251 = vrot.lane.b32.xlu1 %v948_v12, %s2333_s10 }
 0x1e7   : > { %1487 = vrot.lane.b32.xlu0 %v1070_v40, %s2334_s25 }
 0x1e9   : > { %1243 = vrot.lane.b32.xlu1 %v950_v13, %s2333_s10 }
 0x1eb   : > { %1253 = vrot.lane.b32.xlu0 %v952_v14, %s2333_s10  ;;  %v2950_v14 = vrot.slane %v2924_v6, %v2568_v3 }
 0x1ed   : > { %1497 = vrot.lane.b32.xlu1 %v1072_v41, %s2334_s25 }
 0x1ef   : > { %1245 = vrot.lane.b32.xlu0 %v956_v15, %s2333_s10 }
 0x1f1   : > { %1489 = vrot.lane.b32.xlu1 %v1076_v42, %s2334_s25 }
 0x1f3   : > { %1499 = vrot.lane.b32.xlu0 %v1078_v44, %s2334_s25  ;;  %v978_v44 = vpop.f32.mrf.mxu0 }
 0x1f5   : > { %v1118_v18 = vpop.permute.xlu0 %1117  ;;  %1255 = vrot.lane.b32.xlu1 %v958_v7, %s2333_s10  ;;  %v2961_v7 = vrot.slane %v2924_v6, %v2565_v2 }
 0x1f7   : > { %v1128_v19 = vpop.permute.xlu1 %1127  ;;  %1296 = vrot.lane.b32.xlu0 %v960_v10, %s2335_s27 }
 0x1f8   : > { %v2846_v21 = vsel %vm1139_vm0, %v1118_v18, %v1128_v19  ;;  %v2850_v0 = vsel %vm1139_vm0, %v1128_v19, %v1118_v18 }
 0x1f9   : > { %v1120_v22 = vpop.permute.xlu0 %1119  ;;  %1306 = vrot.lane.b32.xlu1 %v962_v20, %s2335_s27  ;;  %v1158_v18 = vmul.f32 %v2938_v11, %v2846_v21  ;;  %v1159_v19 = vmul.f32 %v2950_v14, %v2850_v0 }
 0x1fb   : > { %v1376_v23 = vpop.permute.xlu1 %1375  ;;  %1491 = vrot.lane.b32.xlu0 %v2787_v46, %s2334_s25 }
 0x1fd   : > { %v1366_v24 = vpop.permute.xlu0 %1365  ;;  %1501 = vrot.lane.b32.xlu1 %v2790_v47, %s2334_s25 }
 0x1fe   : > { %v2860_v26 = vsel %vm1385_vm1, %v1366_v24, %v1376_v23  ;;  %v2864_v27 = vsel %vm1385_vm1, %v1376_v23, %v1366_v24 }
 0x1ff   : > { %v1122_v28 = vpop.permute.xlu1 %1121  ;;  %1542 = vrot.lane.b32.xlu0 %v2793_v49, %s2336_s28  ;;  %v980_v49 = vpop.f32.mrf.mxu0 }
 0x201   : > { %v1130_v29 = vpop.permute.xlu0 %1129  ;;  %1298 = vrot.lane.b32.xlu1 %v966_v17, %s2335_s27  ;;  %v982_v56 = vpop.f32.mrf.mxu0 }
 0x202   : > { %v2871_v31 = vsel %vm1139_vm0, %v1120_v22, %v1130_v29  ;;  %v2875_v32 = vsel %vm1139_vm0, %v1130_v29, %v1120_v22 }
 0x203   : > { %v1368_v33 = vpop.permute.xlu1 %1367  ;;  %1308 = vrot.lane.b32.xlu0 %v968_v25, %s2335_s27  ;;  %v1160_v29 = vmul.f32 %v2938_v11, %v2871_v31 }
 0x205   : > { %v1378_v34 = vpop.permute.xlu0 %1377  ;;  %1544 = vrot.lane.b32.xlu1 %v2799_v52, %s2336_s28 }
 0x206   : > { %v2882_v36 = vsel %vm1385_vm1, %v1368_v33, %v1378_v34  ;;  %v2886_v37 = vsel %vm1385_vm1, %v1378_v34, %v1368_v33 }
 0x207   : > { %v1132_v38 = vpop.permute.xlu1 %1131  ;;  %1300 = vrot.lane.b32.xlu0 %v970_v30, %s2335_s27  ;;  %v1161_v30 = vmul.f32 %v2950_v14, %v2875_v32 }
 0x208   : > { %v2891_v40 = vsel %vm1139_vm0, %v1122_v28, %v1132_v38  ;;  %v2895_v41 = vsel %vm1139_vm0, %v1132_v38, %v1122_v28 }
 0x209   : > { %v1370_v42 = vpop.permute.xlu0 %1369  ;;  %1310 = vrot.lane.b32.xlu1 %v972_v35, %s2335_s27 }
 0x20b   : > { %v1124_v43 = vpop.permute.xlu1 %1123  ;;  %1546 = vrot.lane.b32.xlu0 %v2805_v55, %s2336_s28 }
 0x20d   : > { %v1134_v45 = vpop.permute.xlu0 %1133  ;;  %1302 = vrot.lane.b32.xlu1 %v976_v39, %s2335_s27 }
 0x20e   : > { %v2903_v46 = vsel %vm1139_vm0, %v1124_v43, %v1134_v45  ;;  %v2907_v47 = vsel %vm1139_vm0, %v1134_v45, %v1124_v43 }
 0x20f   : > { %v1380_v48 = vpop.permute.xlu1 %1379  ;;  %1312 = vrot.lane.b32.xlu0 %v978_v44, %s2335_s27 }
 0x210   : > { %v2912_v51 = vsel %vm1385_vm1, %v1370_v42, %v1380_v48  ;;  %v2916_v52 = vsel %vm1385_vm1, %v1380_v48, %v1370_v42 }
 0x211   : > { %v1126_v54 = vpop.permute.xlu0 %1125  ;;  %1548 = vrot.lane.b32.xlu1 %v2811_v58, %s2336_s28 }
 0x213   : > { %v1372_v55 = vpop.permute.xlu1 %1371  ;;  %1304 = vrot.lane.b32.xlu0 %v980_v49, %s2335_s27 }
 0x215   : > { %v1382_v5 = vpop.permute.xlu0 %1381  ;;  %1314 = vrot.lane.b32.xlu1 %v982_v56, %s2335_s27  ;;  %v1163_v56 = vmul.f32 %v2950_v14, %v2895_v41  ;;  %v1164_v41 = vmul.f32 %v2938_v11, %v2903_v46 }
 0x216   : > { %v2928_v8 = vsel %vm1385_vm1, %v1372_v55, %v1382_v5  ;;  %v2932_v9 = vsel %vm1385_vm1, %v1382_v5, %v1372_v55  ;;  %v1162_v55 = vmul.f32 %v2938_v11, %v2891_v40 }
 0x217   : > { %v1136_v58 = vpop.permute.xlu1 %1135  ;;  %1554 = vrot.lane.b32.xlu0 %v2802_v53, %s2336_s28  ;;  %v2957_v53 = vrot.slane %v2921_v59, %v2565_v2 }
 0x218   : > { %v2942_v12 = vsel %vm1139_vm0, %v1126_v54, %v1136_v58  ;;  %v2946_v13 = vsel %vm1139_vm0, %v1136_v58, %v1126_v54 }
 0x219   : > { %v1179_v15 = vpop.permute.xlu0 %1178  ;;  %1552 = vrot.lane.b32.xlu1 %v2796_v50, %s2336_s28 }
 0x21b   : > { %v1189_v10 = vpop.permute.xlu1 %1188  ;;  %1550 = vrot.lane.b32.xlu0 %v2817_v63, %s2336_s28 }
 0x21c   : > { %v1199_v3 = vsel %vm1198_vm2, %v1179_v15, %v1189_v10  ;;  %v1204_v50 = vsel %vm1198_vm2, %v1189_v10, %v1179_v15 }
 0x21d   : > { %v1217_v20 = vmul.f32 %v2957_v53, %v1199_v3  ;;  %v1218_v2 = vmul.f32 %v2961_v7, %v1204_v50  ;;  %v1374_v22 = vpop.permute.xlu0 %1373  ;;  %1556 = vrot.lane.b32.xlu1 %v2808_v57, %s2336_s28 }
 0x21f   : > { %v2977_v63 = vadd.f32 %v1217_v20, %v1158_v18  ;;  %v2979_v17 = vadd.f32 %v1218_v2, %v1159_v19  ;;  %v1384_v23 = vpop.permute.xlu1 %1383  ;;  %1558 = vrot.lane.b32.xlu0 %v2814_v61, %s2336_s28  ;;  %v1165_v20 = vmul.f32 %v2950_v14, %v2907_v47 }
 0x220   : > { %v2985_v21 = vsel %vm1385_vm1, %v1374_v22, %v1384_v23  ;;  %v2989_v0 = vsel %vm1385_vm1, %v1384_v23, %v1374_v22 }
 0x221   : > { %v1425_v24 = vpop.permute.xlu0 %1424  ;;  %1560 = vrot.lane.b32.xlu1 %v2820_v4, %s2336_s28 }
 0x223   : > { %v1181_v57 = vpop.permute.xlu1 %1180 }
 0x225   : > { %v1191_v25 = vpop.permute.xlu0 %1190 }
 0x226   : > { %v1200_v28 = vsel %vm1198_vm2, %v1181_v57, %v1191_v25  ;;  %v1205_v61 = vsel %vm1198_vm2, %v1191_v25, %v1181_v57 }
 0x227   : > { %v1219_v33 = vmul.f32 %v2957_v53, %v1200_v28  ;;  %v1220_v4 = vmul.f32 %v2961_v7, %v1205_v61  ;;  %v1435_v34 = vpop.permute.xlu1 %1434 }
 0x228   : > { %v3006_v35 = vsel %vm1444_vm3, %v1425_v24, %v1435_v34  ;;  %v3010_v38 = vsel %vm1444_vm3, %v1435_v34, %v1425_v24 }
 0x229   : > { %v3012_v39 = vadd.f32 %v1219_v33, %v1160_v29  ;;  %v3014_v42 = vadd.f32 %v1220_v4, %v1161_v30  ;;  %v1183_v31 = vpop.permute.xlu0 %1182 }
 0x22b   : > { %v1427_v43 = vpop.permute.xlu1 %1426 }
 0x22d   : > { %v1437_v32 = vpop.permute.xlu0 %1436 }
 0x22e   : > { %v3018_v44 = vsel %vm1444_vm3, %v1427_v43, %v1437_v32  ;;  %v3022_v45 = vsel %vm1444_vm3, %v1437_v32, %v1427_v43  ;;  %v1167_v43 = vmul.f32 %v2950_v14, %v2946_v13 }
 0x22f   : > { %v1193_v48 = vpop.permute.xlu1 %1192 }
 0x230   : > { %v1201_v49 = vsel %vm1198_vm2, %v1183_v31, %v1193_v48  ;;  %v1206_v54 = vsel %vm1198_vm2, %v1193_v48, %v1183_v31  ;;  %v1166_v31 = vmul.f32 %v2938_v11, %v2942_v12 }
 0x231   : > { %v1221_v5 = vmul.f32 %v2957_v53, %v1201_v49  ;;  %v1222_v58 = vmul.f32 %v2961_v7, %v1206_v54  ;;  %v1429_v15 = vpop.permute.xlu0 %1428 }
 0x233   : > { %v3034_v10 = vadd.f32 %v1221_v5, %v1162_v55  ;;  %v3036_v3 = vadd.f32 %v1222_v58, %v1163_v56  ;;  %v1185_v50 = vpop.permute.xlu1 %1184 }
 0x235   : > { %v1195_v18 = vpop.permute.xlu0 %1194 }
 0x236   : > { %v1202_v19 = vsel %vm1198_vm2, %v1185_v50, %v1195_v18  ;;  %v1207_v40 = vsel %vm1198_vm2, %v1195_v18, %v1185_v50 }
 0x237   : > { %v1223_v2 = vmul.f32 %v2957_v53, %v1202_v19  ;;  %v1224_v22 = vmul.f32 %v2961_v7, %v1207_v40  ;;  %v1439_v23 = vpop.permute.xlu1 %1438 }
 0x238   : > { %v3050_v24 = vsel %vm1444_vm3, %v1429_v15, %v1439_v23  ;;  %v3054_v57 = vsel %vm1444_vm3, %v1439_v23, %v1429_v15 }
 0x239   : > { %v3056_v25 = vadd.f32 %v1223_v2, %v1164_v41  ;;  %v3058_v28 = vadd.f32 %v1224_v22, %v1165_v20  ;;  %v1187_v46 = vpop.permute.xlu0 %1186  ;;  %v1270_v22 = vsub.s32 2, %v2562_v1 }
 0x23b   : > { %3491 = vst [vmem:[#allocation18_spill] sm:$0xff] %v3056_v25  ;;  %3492 = vst [vmem:[#allocation19_spill] sm:$0xff] %v3058_v28  ;;  %v1431_v61 = vpop.permute.xlu1 %1430 }
 0x23d   : > { %v1441_v47 = vpop.permute.xlu0 %1440 }
 0x23e   : > { %v3062_v29 = vsel %vm1444_vm3, %v1431_v61, %v1441_v47  ;;  %v3066_v30 = vsel %vm1444_vm3, %v1441_v47, %v1431_v61  ;;  %v3113_v61 = vrot.slane %v2921_v59, %v1270_v22  ;;  %v3116_v47 = vrot.slane %v2924_v6, %v1270_v22 }
 0x23f   : > { %v1197_v33 = vpop.permute.xlu1 %1196 }
 0x240   : > { %v1203_v4 = vsel %vm1198_vm2, %v1187_v46, %v1197_v33  ;;  %v1208_v34 = vsel %vm1198_vm2, %v1197_v33, %v1187_v46 }
 0x241   : > { %v1225_v32 = vmul.f32 %v2957_v53, %v1203_v4  ;;  %v1226_v48 = vmul.f32 %v2961_v7, %v1208_v34  ;;  %v1238_v49 = vpop.permute.xlu0 %1237  ;;  %v1329_v4 = vsub.s32 3, %v2562_v1 }
 0x243   : > { %v3078_v54 = vadd.f32 %v1225_v32, %v1166_v31  ;;  %v3080_v55 = vadd.f32 %v1226_v48, %v1167_v43  ;;  %v1248_v56 = vpop.permute.xlu1 %1247  ;;  %v1398_v43 = vsub.s32 5, %v2562_v1  ;;  %v1457_v48 = vsub.s32 6, %v2562_v1 }
 0x244   : > { %v1258_v34 = vsel %vm1257_vm4, %v1238_v49, %v1248_v56  ;;  %v1263_v31 = vsel %vm1257_vm4, %v1248_v56, %v1238_v49  ;;  %v3133_v62 = vrot.slane %v2921_v59, %v1329_v4  ;;  %v3136_v60 = vrot.slane %v2924_v6, %v1329_v4  ;;  %v986_v56 = vpop.f32.mrf.mxu0 }
 0x245   : > { %3493 = vst [vmem:[#allocation20_spill] sm:$0xff] %v3078_v54  ;;  %3494 = vst [vmem:[#allocation21_spill] sm:$0xff] %v3080_v55  ;;  %v1433_v5 = vpop.permute.xlu0 %1432  ;;  %v1516_v49 = vsub.s32 7, %v2562_v1  ;;  %v1399_v55 = vrot.slane %v2921_v59, %v1398_v43 }
 0x247   : > { %v1443_v58 = vpop.permute.xlu1 %1442 }
 0x248   : > { %v3084_v15 = vsel %vm1444_vm3, %v1433_v5, %v1443_v58  ;;  %v3088_v11 = vsel %vm1444_vm3, %v1443_v58, %v1433_v5  ;;  %v1276_v5 = vmul.f32 %v3113_v61, %v1258_v34  ;;  %v1277_v58 = vmul.f32 %v3116_v47, %v1263_v31 }
 0x249   : > { %v1484_v12 = vpop.permute.xlu0 %1483 }
 0x24a   : > { %v1286_v25 = vadd.f32 %v1276_v5, %v2977_v63 }
 0x24b   : > { %v1240_v13 = vpop.permute.xlu1 %1239 }
 0x24d   : > { %v1250_v14 = vpop.permute.xlu0 %1249 }
 0x24e   : > { %v1264_v63 = vsel %vm1257_vm4, %v1250_v14, %v1240_v13 }
 0x24f   : > { %v1494_v53 = vpop.permute.xlu1 %1493 }
 0x251   : > { %v3090_v7 = vpop.permute.xlu0 %1241 }
 0x253   : > { %v3092_v50 = vpop.permute.xlu1 %1485 }
 0x255   : > { %v3094_v18 = vpop.permute.xlu0 %1495 }
 0x257   : > { %v3096_v19 = vpop.permute.xlu1 %1251 }
 0x259   : > { %v3098_v40 = vpop.permute.xlu0 %1487 }
 0x25a   : > { %3495 = vst [vmem:[#allocation22_spill] sm:$0xff] %v3098_v40 }
 0x25b   : > { %v3100_v41 = vpop.permute.xlu1 %1243 }
 0x25d   : > { %v3102_v20 = vpop.permute.xlu0 %1253 }
 0x25f   : > { %v3104_v2 = vpop.permute.xlu1 %1497 }
 0x261   : > { %v3107_v23 = vpop.permute.xlu0 %1245 }
 0x262   : > { %3496 = vst [vmem:[#allocation23_spill] sm:$0xff] %v3107_v23  ;;  %v1287_v23 = vadd.f32 %v1277_v58, %v2979_v17  ;;  %v1404_v58 = vmul.f32 %v1399_v55, %v2864_v27 }
 0x263   : > { %v3110_v46 = vpop.permute.xlu1 %1489 }
 0x264   : > { %3497 = vst [vmem:[#allocation24_spill] sm:$0xff] %v3110_v46  ;;  %v1403_v46 = vrot.slane %v2924_v6, %v1398_v43  ;;  %v3155_v43 = vrot.slane %v2924_v6, %v1457_v48 }
 0x265   : > { %v3118_v33 = vpop.permute.xlu0 %1499 }
 0x266   : > { %3498 = vst [vmem:[#allocation25_spill] sm:$0xff] %v3118_v33  ;;  %v3142_v33 = vrot.slane %v2921_v59, %v1457_v48  ;;  %v3184_v27 = vmul.f32 %v1403_v46, %v2912_v51 }
 0x267   : > { %v3126_v32 = vpop.permute.xlu1 %1255 }
 0x268   : > { %3499 = vst [vmem:[#allocation26_spill] sm:$0xff] %v3126_v32  ;;  %v3159_v32 = vrot.slane %v2921_v59, %v1516_v49  ;;  %v1406_v59 = vmul.f32 %v1399_v55, %v2886_v37  ;;  %v1463_v37 = vmul.f32 %v3142_v33, %v3010_v38  ;;  %v1260_v38 = vsel %vm1257_vm4, %v3090_v7, %v3096_v19 }
 0x269   : > { %v1297_v22 = vpop.permute.xlu0 %1296 }
 0x26b   : > { %v1307_v54 = vpop.permute.xlu1 %1306 }
 0x26c   : > { %v1317_v34 = vsel %vm1316_vm5, %v1297_v22, %v1307_v54  ;;  %v1322_v31 = vsel %vm1316_vm5, %v1307_v54, %v1297_v22  ;;  %v3162_v54 = vrot.slane %v2924_v6, %v1516_v49  ;;  %v988_v22 = vpop.f32.mrf.mxu0  ;;  %v1407_v6 = vmul.f32 %v1403_v46, %v2882_v36 }
 0x26d   : > { %v1335_v4 = vmul.f32 %v3133_v62, %v1317_v34  ;;  %v1336_v28 = vmul.f32 %v3136_v60, %v1322_v31  ;;  %v3150_v1 = vpop.permute.xlu0 %1491  ;;  %v1259_v34 = vsel %vm1257_vm4, %v1240_v13, %v1250_v14  ;;  %v1405_v31 = vmul.f32 %v1403_v46, %v2860_v26 }
 0x26e   : > { %3500 = vst [vmem:[#allocation27_spill] sm:$0xff] %v3150_v1  ;;  %v1504_v49 = vsel %vm1503_vm6, %v1484_v12, %v1494_v53  ;;  %v1509_v1 = vsel %vm1503_vm6, %v1494_v53, %v1484_v12  ;;  %v1278_v26 = vmul.f32 %v3113_v61, %v1259_v34  ;;  %v1279_v36 = vmul.f32 %v3116_v47, %v1264_v63 }
 0x26f   : > { %v1345_v5 = vadd.f32 %v1335_v4, %v1286_v25  ;;  %v3168_v17 = vpop.permute.xlu1 %1501  ;;  %v1346_v48 = vadd.f32 %v1336_v28, %v1287_v23  ;;  %v3181_v28 = vmul.f32 %v1399_v55, %v2916_v52  ;;  %v1464_v12 = vmul.f32 %v3155_v43, %v3006_v35 }
 0x270   : > { %v3196_v52 = vmul.f32 %v1403_v46, %v2928_v8  ;;  %v1522_v51 = vmul.f32 %v3159_v32, %v1509_v1  ;;  %v1523_v4 = vmul.f32 %v3162_v54, %v1504_v49  ;;  %v1265_v35 = vsel %vm1257_vm4, %v3096_v19, %v3090_v7 }
 0x271   : > { %v1355_v40 = vadd.f32 %v1345_v5, %v986_v56  ;;  %v1356_v13 = vadd.f32 %v1346_v48, %v988_v22  ;;  %v3178_v25 = vpop.permute.xlu0 %1542  ;;  %v3193_v56 = vmul.f32 %v1399_v55, %v2932_v9  ;;  %v990_v22 = vpop.f32.mrf.mxu0  ;;  %v1288_v63 = vadd.f32 %v1278_v26, %v3012_v39 }
 0x272   : > { %v1289_v5 = vadd.f32 %v1279_v36, %v3014_v42  ;;  %v3223_v49 = vmul.f32 %v1399_v55, %v2989_v0  ;;  %v1280_v39 = vmul.f32 %v3113_v61, %v1260_v38  ;;  %v1281_v42 = vmul.f32 %v3116_v47, %v1265_v35 }
 0x273   : > { %v1414_v14 = vadd.f32 %v1404_v58, %v1355_v40  ;;  %v1415_v53 = vadd.f32 %v1405_v31, %v1356_v13  ;;  %v1299_v23 = vpop.permute.xlu1 %1298  ;;  %v3226_v13 = vmul.f32 %v1403_v46, %v2985_v21  ;;  %v992_v26 = vpop.f32.mrf.mxu0  ;;  %v1465_v36 = vmul.f32 %v3142_v33, %v3022_v45 }
 0x274   : > { %v1467_v0 = vmul.f32 %v3142_v33, %v3054_v57  ;;  %v1468_v21 = vmul.f32 %v3155_v43, %v3050_v24  ;;  %v3240_v55 = vmul.f32 %v3142_v33, %v3066_v30  ;;  %v3244_v46 = vmul.f32 %v3155_v43, %v3062_v29 }
 0x275   : > { %v1473_v9 = vadd.f32 %v1463_v37, %v1414_v14  ;;  %v1474_v40 = vadd.f32 %v1464_v12, %v1415_v53  ;;  %v1309_v34 = vpop.permute.xlu0 %1308  ;;  %v1466_v37 = vmul.f32 %v3155_v43, %v3018_v44  ;;  %v996_v45 = vpop.f32.mrf.mxu0  ;;  %v1261_v44 = vsel %vm1257_vm4, %v3100_v41, %v3102_v20 }
 0x276   : > { %v1318_v8 = vsel %vm1316_vm5, %v1299_v23, %v1309_v34  ;;  %v1323_v1 = vsel %vm1316_vm5, %v1309_v34, %v1299_v23  ;;  %v1266_v57 = vsel %vm1257_vm4, %v3102_v20, %v3100_v41  ;;  %v1291_v38 = vadd.f32 %v1281_v42, %v3036_v3  ;;  %v3503_v42 = vld [vmem:[#allocation23_spill] sm:$0xff] }
 0x277   : > { %v3214_v48 = vadd.f32 %v1522_v51, %v1473_v9  ;;  %v3216_v58 = vadd.f32 %v1523_v4, %v1474_v40  ;;  %v1337_v31 = vmul.f32 %v3133_v62, %v1318_v8  ;;  %v1338_v7 = vmul.f32 %v3136_v60, %v1323_v1  ;;  %v3220_v19 = vpop.permute.xlu1 %1544 }
 0x278   : > { %v1290_v4 = vadd.f32 %v1280_v39, %v3034_v10  ;;  %v3266_v20 = vmul.f32 %v3142_v33, %v3088_v11  ;;  %v1282_v10 = vmul.f32 %v3113_v61, %v1261_v44  ;;  %v1283_v3 = vmul.f32 %v3116_v47, %v1266_v57  ;;  %v3501_v33 = vld [vmem:[#allocation22_spill] sm:$0xff]  ;;  %v3505_v44 = vld [vmem:[#allocation19_spill] sm:$0xff] }
 0x279   : > { %v1347_v12 = vadd.f32 %v1337_v31, %v1288_v63  ;;  %v1301_v14 = vpop.permute.xlu0 %1300  ;;  %v1348_v53 = vadd.f32 %v1338_v7, %v1289_v5  ;;  %v1505_v11 = vsel %vm1503_vm6, %v3092_v50, %v3094_v18  ;;  %v1511_v31 = vsel %vm1503_vm6, %v3104_v2, %v3501_v33  ;;  %v3502_v39 = vld [vmem:[#allocation26_spill] sm:$0xff] }
 0x27a   : > { %v1293_v57 = vadd.f32 %v1283_v3, %v3505_v44 }
 0x27b   : > { %v1357_v24 = vadd.f32 %v1347_v12, %v990_v22  ;;  %v1358_v23 = vadd.f32 %v1348_v53, %v992_v26  ;;  %v1311_v51 = vpop.permute.xlu1 %1310  ;;  %v3270_v22 = vmul.f32 %v3155_v43, %v3084_v15  ;;  %v1510_v15 = vsel %vm1503_vm6, %v3094_v18, %v3092_v50 }
 0x27c   : > { %v1319_v30 = vsel %vm1316_vm5, %v1301_v14, %v1311_v51  ;;  %v1324_v29 = vsel %vm1316_vm5, %v1311_v51, %v1301_v14  ;;  %v1506_v43 = vsel %vm1503_vm6, %v3501_v33, %v3104_v2  ;;  %v1262_v26 = vsel %vm1257_vm4, %v3503_v42, %v3502_v39  ;;  %v3504_v14 = vld [vmem:[#allocation18_spill] sm:$0xff] }
 0x27d   : > { %v1416_v35 = vadd.f32 %v1406_v59, %v1357_v24  ;;  %v1417_v9 = vadd.f32 %v1407_v6, %v1358_v23  ;;  %v1339_v40 = vmul.f32 %v3133_v62, %v1319_v30  ;;  %v1340_v34 = vmul.f32 %v3136_v60, %v1324_v29  ;;  %v3262_v41 = vpop.permute.xlu0 %1546  ;;  %v998_v59 = vpop.f32.mrf.mxu0  ;;  %v3506_v29 = vld [vmem:[#allocation25_spill] sm:$0xff] }
 0x27e   : > { %v1267_v50 = vsel %vm1257_vm4, %v3502_v39, %v3503_v42  ;;  %v1292_v53 = vadd.f32 %v1282_v10, %v3504_v14  ;;  %v1527_v33 = vmul.f32 %v3162_v54, %v1506_v43 }
 0x27f   : > { %v1475_v6 = vadd.f32 %v1465_v36, %v1416_v35  ;;  %v1476_v8 = vadd.f32 %v1466_v37, %v1417_v9  ;;  %v1349_v1 = vadd.f32 %v1339_v40, %v1290_v4  ;;  %v1303_v63 = vpop.permute.xlu1 %1302  ;;  %v1350_v5 = vadd.f32 %v1340_v34, %v1291_v38  ;;  %v1000_v7 = vpop.f32.mrf.mxu0  ;;  %v3507_v4 = vld [vmem:[#allocation24_spill] sm:$0xff] }
 0x280   : > { %v1507_v38 = vsel %vm1503_vm6, %v3507_v4, %v3506_v29  ;;  %v1512_v35 = vsel %vm1503_vm6, %v3506_v29, %v3507_v4  ;;  %v3512_v4 = vld [vmem:[#allocation17_spill] sm:$0xff] }
 0x281   : > { %v1359_v18 = vadd.f32 %v1349_v1, %v996_v45  ;;  %v1360_v36 = vadd.f32 %v1350_v5, %v998_v59  ;;  %v1313_v37 = vpop.permute.xlu0 %1312  ;;  %v1002_v9 = vpop.f32.mrf.mxu0  ;;  %v1524_v1 = vmul.f32 %v3159_v32, %v1510_v15  ;;  %v1526_v5 = vmul.f32 %v3159_v32, %v1511_v31 }
 0x282   : > { %v1320_v12 = vsel %vm1316_vm5, %v1303_v63, %v1313_v37  ;;  %v1325_v2 = vsel %vm1316_vm5, %v1313_v37, %v1303_v63  ;;  %v1525_v63 = vmul.f32 %v3162_v54, %v1505_v11  ;;  %v1528_v39 = vmul.f32 %v3159_v32, %v1512_v35  ;;  %v3337_v37 = vld [vmem:[#allocation7 + $0x10] ss:$0 sm:$0xff] }
 0x283   : > { %v1418_v24 = vadd.f32 %v3181_v28, %v1359_v18  ;;  %v1419_v23 = vadd.f32 %v3184_v27, %v1360_v36  ;;  %v1341_v51 = vmul.f32 %v3133_v62, %v1320_v12  ;;  %v1342_v45 = vmul.f32 %v3136_v60, %v1325_v2  ;;  %v3309_v30 = vpop.permute.xlu1 %1548  ;;  %v3339_v12 = vld [vmem:[#allocation7 + $0x18] ss:$0 sm:$0xff] }
 0x284   : > { %v1284_v28 = vmul.f32 %v3113_v61, %v1262_v26  ;;  %v1285_v27 = vmul.f32 %v3116_v47, %v1267_v50  ;;  %v1529_v61 = vmul.f32 %v3162_v54, %v1507_v38  ;;  %v3509_v50 = vld [vmem:[#allocation21_spill] sm:$0xff]  ;;  %v1534_v14 = vadd.f32 %v1524_v1, %v1475_v6 }
 0x285   : > { %v1477_v40 = vadd.f32 %v1467_v0, %v1418_v24  ;;  %v1478_v34 = vadd.f32 %v1468_v21, %v1419_v23  ;;  %v1351_v10 = vadd.f32 %v1341_v51, %v1292_v53  ;;  %v1305_v3 = vpop.permute.xlu0 %1304  ;;  %v1352_v59 = vadd.f32 %v1342_v45, %v1293_v57  ;;  %v3508_v0 = vld [vmem:[#allocation20_spill] sm:$0xff] }
 0x286   : > { %v1294_v21 = vadd.f32 %v1284_v28, %v3508_v0  ;;  %v1295_v18 = vadd.f32 %v1285_v27, %v3509_v50  ;;  %v1535_v53 = vadd.f32 %v1525_v63, %v1476_v8  ;;  %v3511_v45 = vld [vmem:[#allocation16_spill] sm:$0xff] }
 0x287   : > { %v1361_v42 = vadd.f32 %v1351_v10, %v1000_v7  ;;  %v1362_v47 = vadd.f32 %v1352_v59, %v1002_v9  ;;  %v1315_v26 = vpop.permute.xlu1 %1314  ;;  %v1536_v10 = vadd.f32 %v1526_v5, %v1477_v40 }
 0x288   : > { %v1321_v15 = vsel %vm1316_vm5, %v1305_v3, %v1315_v26  ;;  %v1326_v11 = vsel %vm1316_vm5, %v1315_v26, %v1305_v3  ;;  %v1537_v3 = vadd.f32 %v1527_v33, %v1478_v34 }
 0x289   : > { %v1420_v43 = vadd.f32 %v3193_v56, %v1361_v42  ;;  %v1421_v31 = vadd.f32 %v3196_v52, %v1362_v47  ;;  %v1343_v36 = vmul.f32 %v3133_v62, %v1321_v15  ;;  %v1344_v7 = vmul.f32 %v3136_v60, %v1326_v11  ;;  %v1555_v2 = vpop.permute.xlu0 %1554 }
 0x28a   : > { %v1564_v44 = vsel %vm1562_vm7, %v3220_v19, %v1555_v2  ;;  %v1569_v56 = vsel %vm1562_vm7, %v1555_v2, %v3220_v19 }
 0x28b   : > { %v1479_v52 = vadd.f32 %v3240_v55, %v1420_v43  ;;  %v1480_v62 = vadd.f32 %v3244_v46, %v1421_v31  ;;  %v1353_v60 = vadd.f32 %v1343_v36, %v1294_v21  ;;  %v1354_v57 = vadd.f32 %v1344_v7, %v1295_v18  ;;  %v1553_v24 = vpop.permute.xlu1 %1552  ;;  %v3510_v55 = vld [vmem:[#allocation27_spill] sm:$0xff] }
 0x28c   : > { %v1583_v23 = vmul.f32 %v3337_v37, %v1569_v56  ;;  %v1584_v6 = vmul.f32 %v3339_v12, %v1564_v44  ;;  %v1563_v8 = vsel %vm1562_vm7, %v3178_v25, %v1553_v24  ;;  %v1568_v19 = vsel %vm1562_vm7, %v1553_v24, %v3178_v25 }
 0x28d   : > { %v1508_v46 = vsel %vm1503_vm6, %v3510_v55, %v3168_v17  ;;  %v1513_v51 = vsel %vm1503_vm6, %v3168_v17, %v3510_v55  ;;  %v1363_v29 = vadd.f32 %v1353_v60, %v3511_v45  ;;  %v1364_v38 = vadd.f32 %v1354_v57, %v3512_v4  ;;  %v1551_v35 = vpop.permute.xlu0 %1550 }
 0x28e   : > { %v1593_v28 = vadd.f32 %v1583_v23, %v1534_v14  ;;  %v1594_v27 = vadd.f32 %v1584_v6, %v1535_v53  ;;  %v1581_v9 = vmul.f32 %v3337_v37, %v1568_v19  ;;  %v1582_v25 = vmul.f32 %v3339_v12, %v1563_v8 }
 0x28f   : > { %v1422_v59 = vadd.f32 %v3223_v49, %v1363_v29  ;;  %v1423_v1 = vadd.f32 %v3226_v13, %v1364_v38  ;;  %v1557_v63 = vpop.permute.xlu1 %1556  ;;  %v1539_v21 = vadd.f32 %v1529_v61, %v1480_v62  ;;  %v1530_v61 = vmul.f32 %v3159_v32, %v1513_v51 }
 0x290   : > { %v1603_v42 = vmul.f32 0.11111111, %v1593_v28  ;;  %v1604_v17 = vmul.f32 0.11111111, %v1594_v27  ;;  %v1591_v47 = vadd.f32 %v1581_v9, %v3214_v48  ;;  %v1592_v26 = vadd.f32 %v1582_v25, %v3216_v58 }
 0x291   : > { %v1565_v0 = vsel %vm1562_vm7, %v3262_v41, %v1557_v63  ;;  %v1570_v40 = vsel %vm1562_vm7, %v1557_v63, %v3262_v41  ;;  %v1559_v34 = vpop.permute.xlu0 %1558  ;;  %v1481_v49 = vadd.f32 %v3266_v20, %v1422_v59  ;;  %v1482_v13 = vadd.f32 %v3270_v22, %v1423_v1 }
 0x292   : > { %1613 = vst [vmem:[%s3382_s29 + $0x10] sm:$0xff] %v1603_v42  ;;  %1614 = vst [vmem:[%s3382_s29 + $0x18] sm:$0xff] %v1604_v17  ;;  %v1601_v48 = vmul.f32 0.11111111, %v1591_v47  ;;  %v1602_v58 = vmul.f32 0.11111111, %v1592_v26  ;;  %v1585_v5 = vmul.f32 %v3337_v37, %v1570_v40  ;;  %v1586_v33 = vmul.f32 %v3339_v12, %v1565_v0 }
 0x293   : > { %v1538_v41 = vadd.f32 %v1528_v39, %v1479_v52  ;;  %v1566_v20 = vsel %vm1562_vm7, %v3309_v30, %v1559_v34  ;;  %v1571_v22 = vsel %vm1562_vm7, %v1559_v34, %v3309_v30  ;;  %v1561_v50 = vpop.permute.xlu1 %1560  ;;  %v1531_v43 = vmul.f32 %v3162_v54, %v1508_v46 }
 0x294   : > { %1611 = vst [vmem:[%s3382_s29] sm:$0xff] %v1601_v48  ;;  %1612 = vst [vmem:[%s3382_s29 + $0x8] sm:$0xff] %v1602_v58  ;;  %v1595_v18 = vadd.f32 %v1585_v5, %v1536_v10  ;;  %v1596_v15 = vadd.f32 %v1586_v33, %v1537_v3  ;;  %v1587_v11 = vmul.f32 %v3337_v37, %v1571_v22 }
 0x295   : > { %v1588_v39 = vmul.f32 %v3339_v12, %v1566_v20  ;;  %v1567_v30 = vsel %vm1562_vm7, %v1551_v35, %v1561_v50  ;;  %v1572_v31 = vsel %vm1562_vm7, %v1561_v50, %v1551_v35  ;;  %v1540_v53 = vadd.f32 %v1530_v61, %v1481_v49 }
 0x296   : > { %v1605_v36 = vmul.f32 0.11111111, %v1595_v18  ;;  %v1606_v7 = vmul.f32 0.11111111, %v1596_v15  ;;  %v1597_v2 = vadd.f32 %v1587_v11, %v1538_v41  ;;  %v1541_v44 = vadd.f32 %v1531_v43, %v1482_v13 }
 0x297   : > { %v1598_v14 = vadd.f32 %v1588_v39, %v1539_v21  ;;  %v1589_v32 = vmul.f32 %v3337_v37, %v1572_v31  ;;  %v1590_v54 = vmul.f32 %v3339_v12, %v1567_v30 }
 0x298   : > { %1615 = vst [vmem:[%s3382_s29 + $0x20] sm:$0xff] %v1605_v36  ;;  %1616 = vst [vmem:[%s3382_s29 + $0x28] sm:$0xff] %v1606_v7  ;;  %v1607_v16 = vmul.f32 0.11111111, %v1597_v2 }
 0x299   : > { %v1608_v56 = vmul.f32 0.11111111, %v1598_v14  ;;  %v1599_v52 = vadd.f32 %v1589_v32, %v1540_v53  ;;  %v1600_v62 = vadd.f32 %v1590_v54, %v1541_v44 }
 0x29a   : > { %1617 = vst [vmem:[%s3382_s29 + $0x30] sm:$0xff] %v1607_v16 }
 0x29b   : > { %1618 = vst [vmem:[%s3382_s29 + $0x38] sm:$0xff] %v1608_v56  ;;  %v1609_v37 = vmul.f32 0.11111111, %v1599_v52  ;;  %v1610_v60 = vmul.f32 0.11111111, %v1600_v62 }
 0x29d   : > { %1619 = vst [vmem:[%s3382_s29 + $0x40] sm:$0xff] %v1609_v37  ;;  %1620 = vst [vmem:[%s3382_s29 + $0x48] sm:$0xff] %v1610_v60 }
 0x29e   : > { %2255 = shalt.err (!%p2252_p3)
}
 0x29f   : > { %s2256_s8 = scalar_lea.hbm %s3415_s23, 1280  ;;  %s2260_s28 = scalar_lea.hbm %s3467_s4, 2560 }
 0x2a0   : > { %p2257_p2 = scmp.ne.s32.totalorder %s3415_s23, %s2256_s8  ;;  %p2261_p11 = scmp.lt.s32.totalorder %s3415_s23, %s3467_s4 }
 0x2a1   : > { %p2262_p10 = scmp.lt.s32.totalorder %s2260_s28, %s2256_s8 }
 0x2a2   : > { %p2258_p0 = pnand %p2257_p2, %p3513_p7 }
 0x2a3   : > { %p2263_p6 = por %p2262_p10, %p2261_p11 }
 0x2a4   : > { %p2259_p8 = pneg %p2258_p0 }
 0x2a6   : > { %p2264_p12 = pnand %p2263_p6, %p2259_p8 }
 0x2a8   : > { %2267 = shalt.err (!%p2264_p12)
}
 0x2a9   : > { %s2338_s5 = smov 256  }
 0x2aa   : > { %1992 = dma.vmem_to_hbm [thread:$0]  (%p3513_p7), %s3417_s7, 1280, %s3415_s23, %s1622_s26, %s2338_s5, %s2338_s5, %s2334_s25  }
 0x2ab PF: > { %s1650_s19 = sand.u32 1, %s2306_s15   ;;  %p3514_p9 = scmp.ne.s32.totalorder %s3478_s22, 0 }
 0x2ac   : > { %p3515_p13 = scmp.ge.s32.totalorder %s2318_s18, 2  ;;  %s1651_s6 = scalar_lea.sflag [#allocation4], %s1650_s19 }
 0x2ae   : > { %p2009_p5 = pnand %p3515_p13, %p3514_p9 }
 0x2b0   : > { %p2010_p1 = pneg %p2009_p5 }
 0x2b2   : > { %2301 = dma.done.wait (%p2010_p1), %s1651_s6, 1280  }
 0x2b3   : > { %2303 = vsyncadd (%p2010_p1), %s1651_s6, 4294966016  ;;  %p21_p4 = scmp.ge.s32.totalorder %s2436_s11, 4   ;;  %s3516_s15 = smov %s2310_s16 }
 0x2b4   : > { %s3517_s16 = smov %s2314_s17  ;;  %s3518_s17 = smov %s2452_s20 }
 0x2b5   : > { %s3519_s18 = smov %s2436_s11  ;;  %23 = sbr.rel (!%p21_p4) target bundleno = 8 (0x8), region = 102 }
 0x2ba   :  { %1656 = vsyncpa [#allocation3], 1 }
 0x2bb   :  { %1658 = vsyncpa [#allocation3 + $0x1], 1 }
 0x2bc   :  { %1659 = vsyncpa [#allocation6], 1 }
 0x2bd   :  { %1661 = vsyncpa [#allocation6 + $0x1], 1 }
 0x2be   :  { %1662 = vsyncpa [#allocation9], 1 }
 0x2bf   :  { %1663 = vsyncpa [#allocation4], 1 }
 0x2c0   :  { %1665 = vsyncpa [#allocation4 + $0x1], 1 }

</bundles_post_ra>
